<compile_context>
chip_gen: v7x
topology: tpu7x:2x2x1
jax: 0.10.0
libtpu: 0.0.40
codegen_flags: <defaults>
</compile_context>

<pallas_src>
import functools
import math

import jax
import jax.numpy as jnp
from jax.experimental import pallas as pl
from jax.experimental.pallas import tpu as pltpu


# ----------------------- generation-dependent sizing ------------------------


def _detect_vmem_bytes():
    try:
        return int(pltpu.get_tpu_info().vmem_capacity_bytes)
    except Exception:
        return 64 * 1024 * 1024  # conservative: assume a 64 MiB part (v7x)


_VMEM_BYTES = _detect_vmem_bytes()
if _VMEM_BYTES >= 128 * 1024 * 1024:          # v5e / v6e: 128 MiB VMEM
    _VMEM_LIMIT = 100 * 1024 * 1024
    _MAX_SEQ_TILE = 512
    _MAX_VOCAB_TILE = 2048
else:                                          # v7x: 64 MiB VMEM per TensorCore
    _VMEM_LIMIT = 48 * 1024 * 1024
    _MAX_SEQ_TILE = 256
    _MAX_VOCAB_TILE = 1024


def _cparams(*sem):
    return pltpu.CompilerParams(dimension_semantics=sem,
                                vmem_limit_bytes=_VMEM_LIMIT)


def _pick_tile(n, cap, granule):
    """Largest divisor of n that is <= cap and a multiple of `granule`; else the full extent."""
    if n <= cap:
        return n
    t = (cap // granule) * granule
    while t >= granule:
        if n % t == 0:
            return t
        t -= granule
    # TODO(synk): pad pathological extents up front instead of falling back to one full tile.
    return n


def _rmsnorm_f32(x_f32, w, eps):
    ms = jnp.mean(x_f32 * x_f32, axis=-1, keepdims=True)
    return x_f32 * jax.lax.rsqrt(ms + eps) * w


# ------------------------------- kernels ------------------------------------


def rmsnorm_qkv_kernel(x_ref, *rest, num_heads, eps, rope):
    # (optional RoPE) -> RMSNorm -> QKV projection -> head-major (nh, st, hd) Q/K/V tiles.
    # TODO(synk): for very large E, stream w_qkv with K/N grid tiling instead of keeping it
    #             fully resident per grid step.
    if rope:
        cos_ref, sin_ref, nw_ref, wqkv_ref, xout_ref, q_ref, k_ref, v_ref = rest
    else:
        nw_ref, wqkv_ref, q_ref, k_ref, v_ref = rest

    x = x_ref[0].astype(jnp.float32)                  # (st, E)
    E = x.shape[-1]
    hd = E // num_heads

    if rope:
        half = E // 2
        if E % 256 == 0:
            # lane-aligned: rotate-half on the XLU (sign folded into the sin table)
            rot = pltpu.roll(x, shift=half, axis=-1)
        else:
            rot = jnp.concatenate([x[:, half:], x[:, :half]], axis=-1)
        x = x * cos_ref[...].astype(jnp.float32) + rot * sin_ref[...].astype(jnp.float32)
        xout_ref[0] = x.astype(xout_ref.dtype)        # rotated residual stream

    xn = _rmsnorm_f32(x, nw_ref[...], eps).astype(x_ref.dtype)
    qkv = jnp.dot(xn, wqkv_ref[...], preferred_element_type=jnp.float32)   # (st, 3E) f32

    scale = 1.0 / math.sqrt(hd)
    for h in range(num_heads):                        # static unroll: contiguous per-head slices
        q_ref[0, h] = (qkv[:, h * hd:(h + 1) * hd] * scale).astype(q_ref.dtype)
        k_ref[0, h] = qkv[:, E + h * hd:E + (h + 1) * hd].astype(k_ref.dtype)
        v_ref[0, h] = qkv[:, 2 * E + h * hd:2 * E + (h + 1) * hd].astype(v_ref.dtype)


def flash_attn_kernel(q_ref, k_ref, v_ref, o_ref, m_sc, l_sc, acc_sc):
    # One (batch, head, q-tile) program; kv-tile is the innermost ("arbitrary") grid axis.
    kv = pl.program_id(3)

    @pl.when(kv == 0)
    def _():
        m_sc[...] = jnp.full(m_sc.shape, -jnp.inf, dtype=jnp.float32)
        l_sc[...] = jnp.zeros(l_sc.shape, dtype=jnp.float32)
        acc_sc[...] = jnp.zeros(acc_sc.shape, dtype=jnp.float32)

    q = q_ref[0, 0]                                   # (qt, hd) bf16, pre-scaled by 1/sqrt(hd)
    k = k_ref[0, 0]                                   # (kt, hd)
    v = v_ref[0, 0]                                   # (kt, hd)

    # scores = q @ k^T without an explicit transpose (contract last dims on the MXU).
    s = jax.lax.dot_general(q, k, (((1,), (1,)), ((), ())),
                            preferred_element_type=jnp.float32)            # (qt, kt)

    m_prev = m_sc[...]
    m_new = jnp.maximum(m_prev, jnp.max(s, axis=-1, keepdims=True))
    alpha = jnp.exp(m_prev - m_new)
    p = jnp.exp(s - m_new)
    l_sc[...] = alpha * l_sc[...] + jnp.sum(p, axis=-1, keepdims=True)
    acc_sc[...] = alpha * acc_sc[...] + jnp.dot(p.astype(v.dtype), v,
                                                preferred_element_type=jnp.float32)
    m_sc[...] = m_new

    @pl.when(kv == pl.num_programs(3) - 1)
    def _():
        o_ref[0, 0] = (acc_sc[...] * pl.reciprocal(l_sc[...], approx=True)).astype(o_ref.dtype)


def outproj_ffn_kernel(x_ref, ctx_ref, nw_ref, wout_ref, win_ref, wgate_ref, whid_ref,
                       o_ref, *, num_heads, eps):
    # out-projection -> residual -> RMSNorm -> relu(linear_in) -> gate -> linear_hidden -> residual
    # fused into one kernel: the activation makes a single HBM round trip for the whole block tail.
    # TODO(synk): for large E/H, stream w_out / w_in / w_gate / w_hidden with K/N grid tiling
    #             (f32 accumulator) instead of keeping all four resident per grid step.
    x = x_ref[0]                                      # (st, E) bf16, layer input (residual stream)
    xf = x.astype(jnp.float32)

    # merge heads back: (nh, st, hd) -> (st, E)  (matches 'b head l k -> b l (head k)')
    ctx = jnp.concatenate([ctx_ref[0, h] for h in range(num_heads)], axis=-1)

    attn = jnp.dot(ctx, wout_ref[...], preferred_element_type=jnp.float32)  # (st, E) f32
    after = xf + attn                                                        # residual 1

    xn = _rmsnorm_f32(after, nw_ref[...], eps).astype(x.dtype)
    hidden = jnp.maximum(
        jnp.dot(xn, win_ref[...], preferred_element_type=jnp.float32), 0.0)  # (st, H) f32
    gate = jnp.dot(hidden.astype(x.dtype), wgate_ref[...],
                   preferred_element_type=jnp.float32)
    ff = jnp.dot((hidden * gate).astype(x.dtype), whid_ref[...],
                 preferred_element_type=jnp.float32)
    o_ref[0] = (after + ff).astype(o_ref.dtype)                              # residual 2


def head_logits_lse_kernel(x_ref, w_ref, b_ref, logits_ref, lse_ref, m_sc, s_sc):
    # Final linear over one vocab tile + online (max, sum-exp) accumulation (vocab axis innermost).
    v_idx = pl.program_id(2)

    @pl.when(v_idx == 0)
    def _():
        m_sc[...] = jnp.full(m_sc.shape, -jnp.inf, dtype=jnp.float32)
        s_sc[...] = jnp.zeros(s_sc.shape, dtype=jnp.float32)

    x = x_ref[0]                                                             # (st, E) bf16
    logits = jnp.dot(x, w_ref[...],
                     preferred_element_type=jnp.float32) + b_ref[...]        # (st, vt) f32
    logits_ref[0] = logits

    m_prev = m_sc[...]
    m_new = jnp.maximum(m_prev, jnp.max(logits, axis=-1, keepdims=True))
    s_sc[...] = (s_sc[...] * jnp.exp(m_prev - m_new)
                 + jnp.sum(jnp.exp(logits - m_new), axis=-1, keepdims=True))
    m_sc[...] = m_new

    @pl.when(v_idx == pl.num_programs(2) - 1)
    def _():
        # exact LSE (no approx reciprocal) so log_softmax stays accurate
        lse_ref[0] = m_sc[...] + jnp.log(s_sc[...])


def log_softmax_finalize_kernel(logits_ref, lse_ref, o_ref):
    o_ref[0] = logits_ref[0] - lse_ref[0]


# ------------------------------- wrappers -----------------------------------


def run_rmsnorm_qkv(x, layer, *, num_heads, eps, rope=None):
    B, S, E = x.shape
    hd = E // num_heads
    st = _pick_tile(S, _MAX_SEQ_TILE, 8)
    grid = (B, S // st)

    x_spec = pl.BlockSpec((1, st, E), lambda b, s: (b, s, 0))
    tbl_spec = pl.BlockSpec((st, E), lambda b, s: (s, 0))
    n_spec = pl.BlockSpec(layer["attn_norm"].shape, lambda b, s: (0, 0))
    w_spec = pl.BlockSpec(layer["w_qkv"].shape, lambda b, s: (0, 0))
    hv_spec = pl.BlockSpec((1, num_heads, st, hd), lambda b, s: (b, 0, s, 0))
    qkv_shape = jax.ShapeDtypeStruct((B, num_heads, S, hd), x.dtype)

    kernel = functools.partial(rmsnorm_qkv_kernel, num_heads=num_heads, eps=eps,
                               rope=rope is not None)
    if rope is not None:
        cos, sin = rope
        return pl.pallas_call(
            kernel,
            out_shape=(jax.ShapeDtypeStruct((B, S, E), x.dtype),
                       qkv_shape, qkv_shape, qkv_shape),
            grid=grid,
            in_specs=[x_spec, tbl_spec, tbl_spec, n_spec, w_spec],
            out_specs=(x_spec, hv_spec, hv_spec, hv_spec),
            compiler_params=_cparams("parallel", "parallel"),
        )(x, cos, sin, layer["attn_norm"], layer["w_qkv"])

    return pl.pallas_call(
        kernel,
        out_shape=(qkv_shape, qkv_shape, qkv_shape),
        grid=grid,
        in_specs=[x_spec, n_spec, w_spec],
        out_specs=(hv_spec, hv_spec, hv_spec),
        compiler_params=_cparams("parallel", "parallel"),
    )(x, layer["attn_norm"], layer["w_qkv"])


def run_flash_attention(q, k, v):
    B, nh, S, hd = q.shape
    qt = _pick_tile(S, _MAX_SEQ_TILE, 8)
    kt = _pick_tile(S, _MAX_SEQ_TILE, 8)
    grid = (B, nh, S // qt, S // kt)
    return pl.pallas_call(
        flash_attn_kernel,
        out_shape=jax.ShapeDtypeStruct((B, nh, S, hd), q.dtype),
        grid=grid,
        in_specs=[pl.BlockSpec((1, 1, qt, hd), lambda b, h, qi, ki: (b, h, qi, 0)),
                  pl.BlockSpec((1, 1, kt, hd), lambda b, h, qi, ki: (b, h, ki, 0)),
                  pl.BlockSpec((1, 1, kt, hd), lambda b, h, qi, ki: (b, h, ki, 0))],
        out_specs=pl.BlockSpec((1, 1, qt, hd), lambda b, h, qi, ki: (b, h, qi, 0)),
        scratch_shapes=[pltpu.VMEM((qt, 1), jnp.float32),
                        pltpu.VMEM((qt, 1), jnp.float32),
                        pltpu.VMEM((qt, hd), jnp.float32)],
        compiler_params=_cparams("parallel", "parallel", "parallel", "arbitrary"),
    )(q, k, v)


def run_outproj_ffn(x, ctx, layer, *, num_heads, eps):
    B, S, E = x.shape
    hd = E // num_heads
    st = _pick_tile(S, _MAX_SEQ_TILE, 8)
    kernel = functools.partial(outproj_ffn_kernel, num_heads=num_heads, eps=eps)
    return pl.pallas_call(
        kernel,
        out_shape=jax.ShapeDtypeStruct((B, S, E), x.dtype),
        grid=(B, S // st),
        in_specs=[pl.BlockSpec((1, st, E), lambda b, s: (b, s, 0)),
                  pl.BlockSpec((1, num_heads, st, hd), lambda b, s: (b, 0, s, 0)),
                  pl.BlockSpec(layer["ff_norm"].shape, lambda b, s: (0, 0)),
                  pl.BlockSpec(layer["w_out"].shape, lambda b, s: (0, 0)),
                  pl.BlockSpec(layer["w_in"].shape, lambda b, s: (0, 0)),
                  pl.BlockSpec(layer["w_gate"].shape, lambda b, s: (0, 0)),
                  pl.BlockSpec(layer["w_hidden"].shape, lambda b, s: (0, 0))],
        out_specs=pl.BlockSpec((1, st, E), lambda b, s: (b, s, 0)),
        compiler_params=_cparams("parallel", "parallel"),
    )(x, ctx, layer["ff_norm"], layer["w_out"], layer["w_in"],
      layer["w_gate"], layer["w_hidden"])


def run_head(x, w, b):
    B, S, E = x.shape
    V = w.shape[1]
    st = _pick_tile(S, _MAX_SEQ_TILE, 8)
    vt = _pick_tile(V, _MAX_VOCAB_TILE, 128)
    grid = (B, S // st, V // vt)

    # pass 1: streamed head-weight tiles -> f32 logits + exact online LSE (vocab axis innermost)
    logits, lse = pl.pallas_call(
        head_logits_lse_kernel,
        out_shape=(jax.ShapeDtypeStruct((B, S, V), jnp.float32),
                   jax.ShapeDtypeStruct((B, S, 1), jnp.float32)),
        grid=grid,
        in_specs=[pl.BlockSpec((1, st, E), lambda bi, si, vi: (bi, si, 0)),
                  pl.BlockSpec((E, vt), lambda bi, si, vi: (0, vi)),
                  pl.BlockSpec((1, vt), lambda bi, si, vi: (0, vi))],
        out_specs=(pl.BlockSpec((1, st, vt), lambda bi, si, vi: (bi, si, vi)),
                   pl.BlockSpec((1, st, 1), lambda bi, si, vi: (bi, si, 0))),
        scratch_shapes=[pltpu.VMEM((st, 1), jnp.float32),
                        pltpu.VMEM((st, 1), jnp.float32)],
        compiler_params=_cparams("parallel", "parallel", "arbitrary"),
    )(x, w, b)

    # pass 2: elementwise log_softmax finalize, done IN PLACE on the logits buffer.
    return pl.pallas_call(
        log_softmax_finalize_kernel,
        out_shape=jax.ShapeDtypeStruct((B, S, V), jnp.float32),
        grid=grid,
        in_specs=[pl.BlockSpec((1, st, vt), lambda bi, si, vi: (bi, si, vi)),
                  pl.BlockSpec((1, st, 1), lambda bi, si, vi: (bi, si, 0))],
        out_specs=pl.BlockSpec((1, st, vt), lambda bi, si, vi: (bi, si, vi)),
        input_output_aliases={0: 0},
        compiler_params=_cparams("parallel", "parallel", "parallel"),
    )(logits, lse)


def transformer_forward(tokens, params, *, num_heads, eps=1e-6):
    # Embedding gather is plain-JAX glue (data-dependent HBM gather).
    x = jnp.take(params["embedding"], tokens, axis=0)                # (B, S, E) bf16
    S = tokens.shape[1]
    rope = (params["rope_cos"][:S], params["rope_sin"][:S])

    for i, layer in enumerate(params["layers"]):
        if i == 0:
            # RoPE fused into the first RMSNorm+QKV kernel (rotated residual stream emitted).
            x, q, k, v = run_rmsnorm_qkv(x, layer, num_heads=num_heads, eps=eps, rope=rope)
        else:
            q, k, v = run_rmsnorm_qkv(x, layer, num_heads=num_heads, eps=eps)
        ctx = run_flash_attention(q, k, v)
        x = run_outproj_ffn(x, ctx, layer, num_heads=num_heads, eps=eps)

    logits = run_head(x, params["head_w"], params["head_b"])
    # matches PyTorch return (logits, None, None) for default flags
    return logits, None, None


# ------------------------------ param init ----------------------------------


def init_params(key, *, vocab_dim, embedding_dim, hidden_dim, num_layers, max_seq_len,
                dtype=jnp.bfloat16):
    E, H, V = embedding_dim, hidden_dim, vocab_dim
    assert H == E, "linear_gate(hidden) requires block_hidden_dim == embedding_dim"
    keys = jax.random.split(key, 2 + 5 * num_layers)
    scale = 0.02

    def normal(k, shape):
        return scale * jax.random.normal(k, shape, dtype=jnp.float32)

    params = {"embedding": normal(keys[0], (V, E)).astype(dtype)}

    # rotate-half RoPE tables for positions [0, max_seq_len); sign folded into sin; bf16 tables.
    inv_freq = 1.0 / (10000.0 ** (jnp.arange(0, E, 2, dtype=jnp.float32) / E))
    pos = jnp.arange(max_seq_len, dtype=jnp.float32)
    ang = pos[:, None] * inv_freq[None, :]                            # (max_seq_len, E/2)
    params["rope_cos"] = jnp.concatenate([jnp.cos(ang), jnp.cos(ang)], axis=-1).astype(dtype)
    params["rope_sin"] = jnp.concatenate([-jnp.sin(ang), jnp.sin(ang)], axis=-1).astype(dtype)

    layers = []
    for l in range(num_layers):
        k = keys[2 + 5 * l: 2 + 5 * (l + 1)]
        # PyTorch Linear weights are (out, in); store transposed (in, out), bf16 for the MXU.
        layers.append({
            "attn_norm": jnp.ones((1, E), jnp.float32),
            "ff_norm": jnp.ones((1, E), jnp.float32),
            "w_qkv": normal(k[0], (3 * E, E)).T.astype(dtype),        # (E, 3E)
            "w_out": normal(k[1], (E, E)).T.astype(dtype),            # (E, E)
            "w_in": normal(k[2], (H, E)).T.astype(dtype),             # (E, H)
            "w_gate": normal(k[3], (H, E)).T.astype(dtype),           # (E, H)  (requires H == E)
            "w_hidden": normal(k[4], (E, H)).T.astype(dtype),         # (H, E)
        })
    params["layers"] = layers

    params["head_w"] = normal(keys[1], (V, E)).T.astype(dtype)        # (E, V)
    params["head_b"] = jnp.zeros((1, V), jnp.float32)
    return params


# --------------------------------- main --------------------------------------


if __name__ == "__main__":
    B, S, E, V = 2, 8, 32, 64
    num_heads, num_layers = 4, 2
    H = E  # block_hidden_dim defaults to embedding_dim
    max_seq_len = 16

    key = jax.random.PRNGKey(0)
    k_params, k_tok = jax.random.split(key)
    params = init_params(k_params, vocab_dim=V, embedding_dim=E, hidden_dim=H,
                         num_layers=num_layers, max_seq_len=max_seq_len)
    tokens = jax.random.randint(k_tok, (B, S), 0, V, dtype=jnp.int32)

    fwd = jax.jit(functools.partial(transformer_forward, num_heads=num_heads))
    logits, hidden_states, attentions = fwd(tokens, params)
    jax.block_until_ready(logits)

    assert logits.shape == (B, S, V)
    assert bool(jnp.all(jnp.isfinite(logits)))
    # log_softmax rows must exponentiate-sum to 1
    assert bool(jnp.allclose(jnp.exp(logits).sum(-1), 1.0, atol=2e-3))
    print("KERNEL_OK")
</pallas_src>

<mosaic_0001>
module attributes {stable_mosaic.version = 11 : i64} {
  func.func @flash_attn_kernel(%arg0: i32, %arg1: i32, %arg2: i32, %arg3: i32, %arg4: memref<1x1x8x8xbf16, #tpu.memory_space<vmem>>, %arg5: memref<1x1x8x8xbf16, #tpu.memory_space<vmem>>, %arg6: memref<1x1x8x8xbf16, #tpu.memory_space<vmem>>, %arg7: memref<1x1x8x8xbf16, #tpu.memory_space<vmem>>, %arg8: memref<8x1xf32, #tpu.memory_space<vmem>>, %arg9: memref<8x1xf32, #tpu.memory_space<vmem>>, %arg10: memref<8x8xf32, #tpu.memory_space<vmem>>) attributes {dimension_semantics = [#tpu.dimension_semantics<parallel>, #tpu.dimension_semantics<parallel>, #tpu.dimension_semantics<parallel>, #tpu.dimension_semantics<arbitrary>], iteration_bounds = array<i64: 2, 4, 1, 1>, scalar_prefetch = 0 : i64, scratch_operands = 3 : i64, tpu.core_type = #tpu.core_type<tc>, window_params = [{transform_indices = @transform_0, window_bounds = array<i64: 1, 1, 8, 8>}, {transform_indices = @transform_1, window_bounds = array<i64: 1, 1, 8, 8>}, {transform_indices = @transform_2, window_bounds = array<i64: 1, 1, 8, 8>}, {transform_indices = @transform_3, window_bounds = array<i64: 1, 1, 8, 8>}]} {
    %c0_i32 = arith.constant 0 : i32
    %0 = arith.cmpi eq, %arg3, %c0_i32 : i32
    %1 = arith.extui %0 : i1 to i32
    %c0_i32_0 = arith.constant 0 : i32
    %2 = arith.cmpi ne, %1, %c0_i32_0 : i32
    scf.if %2 {
      %cst_29 = arith.constant 0xFF800000 : f32
      %36 = vector.broadcast %cst_29 : f32 to vector<8x1xf32>
      %c0_30 = arith.constant 0 : index
      %c0_31 = arith.constant 0 : index
      %37 = vector.load %arg8[%c0_30, %c0_31] : memref<8x1xf32, #tpu.memory_space<vmem>>, vector<8x1xf32>
      tpu.vector_store %arg8[%c0_30, %c0_31], %36 {strides = array<i32>} : memref<8x1xf32, #tpu.memory_space<vmem>>, vector<8x1xf32>,
      %cst_32 = arith.constant 0.000000e+00 : f32
      %38 = vector.broadcast %cst_32 : f32 to vector<8x1xf32>
      %c0_33 = arith.constant 0 : index
      %c0_34 = arith.constant 0 : index
      %39 = vector.load %arg9[%c0_33, %c0_34] : memref<8x1xf32, #tpu.memory_space<vmem>>, vector<8x1xf32>
      tpu.vector_store %arg9[%c0_33, %c0_34], %38 {strides = array<i32>} : memref<8x1xf32, #tpu.memory_space<vmem>>, vector<8x1xf32>,
      %cst_35 = arith.constant 0.000000e+00 : f32
      %40 = vector.broadcast %cst_35 : f32 to vector<8x8xf32>
      %c0_36 = arith.constant 0 : index
      %c0_37 = arith.constant 0 : index
      %41 = vector.load %arg10[%c0_36, %c0_37] : memref<8x8xf32, #tpu.memory_space<vmem>>, vector<8x8xf32>
      tpu.vector_store %arg10[%c0_36, %c0_37], %40 {strides = array<i32>} : memref<8x8xf32, #tpu.memory_space<vmem>>, vector<8x8xf32>,
    } else {
    }
    %c0 = arith.constant 0 : index
    %c0_1 = arith.constant 0 : index
    %c0_2 = arith.constant 0 : index
    %c0_3 = arith.constant 0 : index
    %3 = vector.load %arg4[%c0, %c0_1, %c0_2, %c0_3] : memref<1x1x8x8xbf16, #tpu.memory_space<vmem>>, vector<1x1x8x8xbf16>
    %4 = vector.shape_cast %3 : vector<1x1x8x8xbf16> to vector<8x8xbf16>
    %c0_4 = arith.constant 0 : index
    %c0_5 = arith.constant 0 : index
    %c0_6 = arith.constant 0 : index
    %c0_7 = arith.constant 0 : index
    %5 = vector.load %arg5[%c0_4, %c0_5, %c0_6, %c0_7] : memref<1x1x8x8xbf16, #tpu.memory_space<vmem>>, vector<1x1x8x8xbf16>
    %6 = vector.shape_cast %5 : vector<1x1x8x8xbf16> to vector<8x8xbf16>
    %c0_8 = arith.constant 0 : index
    %c0_9 = arith.constant 0 : index
    %c0_10 = arith.constant 0 : index
    %c0_11 = arith.constant 0 : index
    %7 = vector.load %arg6[%c0_8, %c0_9, %c0_10, %c0_11] : memref<1x1x8x8xbf16, #tpu.memory_space<vmem>>, vector<1x1x8x8xbf16>
    %8 = vector.shape_cast %7 : vector<1x1x8x8xbf16> to vector<8x8xbf16>
    %cst = arith.constant dense<0.000000e+00> : vector<8x8xf32>
    %9 = tpu.matmul %4, %6, %cst {dimension_numbers = #tpu.dot_dimension_numbers<[1], [1], [0], [0], [0, 0, 1, 0], [], []>} : vector<8x8xbf16>, vector<8x8xbf16>, vector<8x8xf32> -> vector<8x8xf32>
    %c0_12 = arith.constant 0 : index
    %c0_13 = arith.constant 0 : index
    %10 = vector.load %arg8[%c0_12, %c0_13] : memref<8x1xf32, #tpu.memory_space<vmem>>, vector<8x1xf32>
    %cst_14 = arith.constant dense<0xFF800000> : vector<8xf32>
    %11 = vector.multi_reduction <maximumf>, %9, %cst_14 [1] : vector<8x8xf32> to vector<8xf32>
    %12 = vector.shape_cast %11 : vector<8xf32> to vector<8x1xf32>
    %13 = arith.maximumf %10, %12 : vector<8x1xf32>
    %14 = arith.subf %10, %13 : vector<8x1xf32>
    %15 = math.exp %14 : vector<8x1xf32>
    %16 = vector.broadcast %13 : vector<8x1xf32> to vector<8x8xf32>
    %17 = arith.subf %9, %16 : vector<8x8xf32>
    %18 = math.exp %17 : vector<8x8xf32>
    %c0_15 = arith.constant 0 : index
    %c0_16 = arith.constant 0 : index
    %19 = vector.load %arg9[%c0_15, %c0_16] : memref<8x1xf32, #tpu.memory_space<vmem>>, vector<8x1xf32>
    %20 = arith.mulf %15, %19 : vector<8x1xf32>
    %cst_17 = arith.constant dense<0.000000e+00> : vector<8xf32>
    %21 = vector.multi_reduction <add>, %18, %cst_17 [1] : vector<8x8xf32> to vector<8xf32>
    %22 = vector.shape_cast %21 : vector<8xf32> to vector<8x1xf32>
    %23 = arith.addf %20, %22 : vector<8x1xf32>
    %c0_18 = arith.constant 0 : index
    %c0_19 = arith.constant 0 : index
    %24 = vector.load %arg9[%c0_18, %c0_19] : memref<8x1xf32, #tpu.memory_space<vmem>>, vector<8x1xf32>
    tpu.vector_store %arg9[%c0_18, %c0_19], %23 {strides = array<i32>} : memref<8x1xf32, #tpu.memory_space<vmem>>, vector<8x1xf32>,
    %c0_20 = arith.constant 0 : index
    %c0_21 = arith.constant 0 : index
    %25 = vector.load %arg10[%c0_20, %c0_21] : memref<8x8xf32, #tpu.memory_space<vmem>>, vector<8x8xf32>
    %26 = vector.broadcast %15 : vector<8x1xf32> to vector<8x8xf32>
    %27 = arith.mulf %26, %25 : vector<8x8xf32>
    %28 = arith.truncf %18 : vector<8x8xf32> to vector<8x8xbf16>
    %cst_22 = arith.constant dense<0.000000e+00> : vector<8x8xf32>
    %29 = tpu.matmul %28, %8, %cst_22 {dimension_numbers = #tpu.dot_dimension_numbers<[1], [0], [0], [1], [0, 0, 1, 1], [], []>} : vector<8x8xbf16>, vector<8x8xbf16>, vector<8x8xf32> -> vector<8x8xf32>
    %30 = arith.addf %27, %29 : vector<8x8xf32>
    %c0_23 = arith.constant 0 : index
    %c0_24 = arith.constant 0 : index
    %31 = vector.load %arg10[%c0_23, %c0_24] : memref<8x8xf32, #tpu.memory_space<vmem>>, vector<8x8xf32>
    tpu.vector_store %arg10[%c0_23, %c0_24], %30 {strides = array<i32>} : memref<8x8xf32, #tpu.memory_space<vmem>>, vector<8x8xf32>,
    %c0_25 = arith.constant 0 : index
    %c0_26 = arith.constant 0 : index
    %32 = vector.load %arg8[%c0_25, %c0_26] : memref<8x1xf32, #tpu.memory_space<vmem>>, vector<8x1xf32>
    tpu.vector_store %arg8[%c0_25, %c0_26], %13 {strides = array<i32>} : memref<8x1xf32, #tpu.memory_space<vmem>>, vector<8x1xf32>,
    %c0_i32_27 = arith.constant 0 : i32
    %33 = arith.cmpi eq, %arg3, %c0_i32_27 : i32
    %34 = arith.extui %33 : i1 to i32
    %c0_i32_28 = arith.constant 0 : i32
    %35 = arith.cmpi ne, %34, %c0_i32_28 : i32
    scf.if %35 {
      %c0_29 = arith.constant 0 : index
      %c0_30 = arith.constant 0 : index
      %36 = vector.load %arg10[%c0_29, %c0_30] : memref<8x8xf32, #tpu.memory_space<vmem>>, vector<8x8xf32>
      %c0_31 = arith.constant 0 : index
      %c0_32 = arith.constant 0 : index
      %37 = vector.load %arg9[%c0_31, %c0_32] : memref<8x1xf32, #tpu.memory_space<vmem>>, vector<8x1xf32>
      %38 = tpu.reciprocal %37 {approx = true} : vector<8x1xf32> -> vector<8x1xf32>
      %39 = vector.broadcast %38 : vector<8x1xf32> to vector<8x8xf32>
      %40 = arith.mulf %36, %39 : vector<8x8xf32>
      %41 = arith.truncf %40 : vector<8x8xf32> to vector<8x8xbf16>
      %c0_33 = arith.constant 0 : index
      %c0_34 = arith.constant 0 : index
      %c0_35 = arith.constant 0 : index
      %c0_36 = arith.constant 0 : index
      %42 = vector.load %arg7[%c0_33, %c0_34, %c0_35, %c0_36] : memref<1x1x8x8xbf16, #tpu.memory_space<vmem>>, vector<1x1x8x8xbf16>
      %43 = vector.shape_cast %42 : vector<1x1x8x8xbf16> to vector<8x8xbf16>
      %44 = vector.shape_cast %41 : vector<8x8xbf16> to vector<1x1x8x8xbf16>
      tpu.vector_store %arg7[%c0_33, %c0_34, %c0_35, %c0_36], %44 {strides = array<i32>} : memref<1x1x8x8xbf16, #tpu.memory_space<vmem>>, vector<1x1x8x8xbf16>,
    } else {
    }
    return
  }
  func.func @transform_0(%arg0: i32, %arg1: i32, %arg2: i32, %arg3: i32) -> (i32, i32, i32, i32) {
    %c0_i32 = arith.constant 0 : i32
    %c0_i32_0 = arith.constant 0 : i32
    return %arg0, %arg1, %arg2, %c0_i32 : i32, i32, i32, i32
  }
  func.func @transform_1(%arg0: i32, %arg1: i32, %arg2: i32, %arg3: i32) -> (i32, i32, i32, i32) {
    %c0_i32 = arith.constant 0 : i32
    %c0_i32_0 = arith.constant 0 : i32
    return %arg0, %arg1, %arg3, %c0_i32 : i32, i32, i32, i32
  }
  func.func @transform_2(%arg0: i32, %arg1: i32, %arg2: i32, %arg3: i32) -> (i32, i32, i32, i32) {
    %c0_i32 = arith.constant 0 : i32
    %c0_i32_0 = arith.constant 0 : i32
    return %arg0, %arg1, %arg3, %c0_i32 : i32, i32, i32, i32
  }
  func.func @transform_3(%arg0: i32, %arg1: i32, %arg2: i32, %arg3: i32) -> (i32, i32, i32, i32) {
    %c0_i32 = arith.constant 0 : i32
    %c0_i32_0 = arith.constant 0 : i32
    return %arg0, %arg1, %arg2, %c0_i32 : i32, i32, i32, i32
  }
}

module attributes {stable_mosaic.version = 11 : i64} {
  func.func @rmsnorm_qkv_kernel(%arg0: i32, %arg1: i32, %arg2: memref<1x8x32xbf16, #tpu.memory_space<vmem>>, %arg3: memref<8x32xbf16, #tpu.memory_space<vmem>>, %arg4: memref<8x32xbf16, #tpu.memory_space<vmem>>, %arg5: memref<1x32xf32, #tpu.memory_space<vmem>>, %arg6: memref<32x96xbf16, #tpu.memory_space<vmem>>, %arg7: memref<1x8x32xbf16, #tpu.memory_space<vmem>>, %arg8: memref<1x4x8x8xbf16, #tpu.memory_space<vmem>>, %arg9: memref<1x4x8x8xbf16, #tpu.memory_space<vmem>>, %arg10: memref<1x4x8x8xbf16, #tpu.memory_space<vmem>>) attributes {dimension_semantics = [#tpu.dimension_semantics<parallel>, #tpu.dimension_semantics<parallel>], iteration_bounds = array<i64: 2, 1>, scalar_prefetch = 0 : i64, scratch_operands = 0 : i64, tpu.core_type = #tpu.core_type<tc>, window_params = [{transform_indices = @transform_0, window_bounds = array<i64: 1, 8, 32>}, {transform_indices = @transform_1, window_bounds = array<i64: 8, 32>}, {transform_indices = @transform_2, window_bounds = array<i64: 8, 32>}, {pipeline_mode = #tpu.pipeline_mode<synchronous>, transform_indices = @transform_3, window_bounds = array<i64: 1, 32>}, {pipeline_mode = #tpu.pipeline_mode<synchronous>, transform_indices = @transform_4, window_bounds = array<i64: 32, 96>}, {transform_indices = @transform_5, window_bounds = array<i64: 1, 8, 32>}, {transform_indices = @transform_6, window_bounds = array<i64: 1, 4, 8, 8>}, {transform_indices = @transform_7, window_bounds = array<i64: 1, 4, 8, 8>}, {transform_indices = @transform_8, window_bounds = array<i64: 1, 4, 8, 8>}]} {
    %c0 = arith.constant 0 : index
    %c0_0 = arith.constant 0 : index
    %c0_1 = arith.constant 0 : index
    %0 = vector.load %arg2[%c0, %c0_0, %c0_1] : memref<1x8x32xbf16, #tpu.memory_space<vmem>>, vector<1x8x32xbf16>
    %1 = vector.shape_cast %0 : vector<1x8x32xbf16> to vector<8x32xbf16>
    %2 = arith.extf %1 : vector<8x32xbf16> to vector<8x32xf32>
    %3 = vector.extract_strided_slice %2 {offsets = [0, 16], sizes = [8, 16], strides = [1, 1]} : vector<8x32xf32> to vector<8x16xf32>
    %4 = vector.extract_strided_slice %2 {offsets = [0, 0], sizes = [8, 16], strides = [1, 1]} : vector<8x32xf32> to vector<8x16xf32>
    %5 = tpu.concatenate %3, %4 in 1 : vector<8x16xf32>, vector<8x16xf32> -> vector<8x32xf32>
    %c0_2 = arith.constant 0 : index
    %c0_3 = arith.constant 0 : index
    %6 = vector.load %arg3[%c0_2, %c0_3] : memref<8x32xbf16, #tpu.memory_space<vmem>>, vector<8x32xbf16>
    %7 = arith.extf %6 : vector<8x32xbf16> to vector<8x32xf32>
    %8 = arith.mulf %2, %7 : vector<8x32xf32>
    %c0_4 = arith.constant 0 : index
    %c0_5 = arith.constant 0 : index
    %9 = vector.load %arg4[%c0_4, %c0_5] : memref<8x32xbf16, #tpu.memory_space<vmem>>, vector<8x32xbf16>
    %10 = arith.extf %9 : vector<8x32xbf16> to vector<8x32xf32>
    %11 = arith.mulf %5, %10 : vector<8x32xf32>
    %12 = arith.addf %8, %11 : vector<8x32xf32>
    %13 = arith.truncf %12 : vector<8x32xf32> to vector<8x32xbf16>
    %c0_6 = arith.constant 0 : index
    %c0_7 = arith.constant 0 : index
    %c0_8 = arith.constant 0 : index
    %14 = vector.load %arg7[%c0_6, %c0_7, %c0_8] : memref<1x8x32xbf16, #tpu.memory_space<vmem>>, vector<1x8x32xbf16>
    %15 = vector.shape_cast %14 : vector<1x8x32xbf16> to vector<8x32xbf16>
    %16 = vector.shape_cast %13 : vector<8x32xbf16> to vector<1x8x32xbf16>
    tpu.vector_store %arg7[%c0_6, %c0_7, %c0_8], %16 {strides = array<i32>} : memref<1x8x32xbf16, #tpu.memory_space<vmem>>, vector<1x8x32xbf16>,
    %c0_9 = arith.constant 0 : index
    %c0_10 = arith.constant 0 : index
    %17 = vector.load %arg5[%c0_9, %c0_10] : memref<1x32xf32, #tpu.memory_space<vmem>>, vector<1x32xf32>
    %18 = arith.mulf %12, %12 : vector<8x32xf32>
    %cst = arith.constant dense<0.000000e+00> : vector<8xf32>
    %19 = vector.multi_reduction <add>, %18, %cst [1] : vector<8x32xf32> to vector<8xf32>
    %20 = vector.shape_cast %19 : vector<8xf32> to vector<8x1xf32>
    %cst_11 = arith.constant 3.200000e+01 : f32
    %21 = vector.broadcast %cst_11 : f32 to vector<8x1xf32>
    %22 = arith.divf %20, %21 : vector<8x1xf32>
    %cst_12 = arith.constant 9.99999997E-7 : f32
    %23 = vector.broadcast %cst_12 : f32 to vector<8x1xf32>
    %24 = arith.addf %22, %23 : vector<8x1xf32>
    %25 = math.rsqrt %24 : vector<8x1xf32>
    %26 = vector.broadcast %25 : vector<8x1xf32> to vector<8x32xf32>
    %27 = arith.mulf %12, %26 : vector<8x32xf32>
    %28 = vector.broadcast %17 : vector<1x32xf32> to vector<8x32xf32>
    %29 = arith.mulf %27, %28 : vector<8x32xf32>
    %30 = arith.truncf %29 : vector<8x32xf32> to vector<8x32xbf16>
    %c0_13 = arith.constant 0 : index
    %c0_14 = arith.constant 0 : index
    %31 = vector.load %arg6[%c0_13, %c0_14] : memref<32x96xbf16, #tpu.memory_space<vmem>>, vector<32x96xbf16>
    %cst_15 = arith.constant dense<0.000000e+00> : vector<8x96xf32>
    %32 = tpu.matmul %30, %31, %cst_15 {dimension_numbers = #tpu.dot_dimension_numbers<[1], [0], [0], [1], [0, 0, 1, 1], [], []>} : vector<8x32xbf16>, vector<32x96xbf16>, vector<8x96xf32> -> vector<8x96xf32>
    %33 = vector.extract_strided_slice %32 {offsets = [0, 0], sizes = [8, 8], strides = [1, 1]} : vector<8x96xf32> to vector<8x8xf32>
    %cst_16 = arith.constant 0.353553385 : f32
    %34 = vector.broadcast %cst_16 : f32 to vector<8x8xf32>
    %35 = arith.mulf %33, %34 : vector<8x8xf32>
    %36 = arith.truncf %35 : vector<8x8xf32> to vector<8x8xbf16>
    %c0_17 = arith.constant 0 : index
    %c0_18 = arith.constant 0 : index
    %c0_19 = arith.constant 0 : index
    %c0_20 = arith.constant 0 : index
    %37 = vector.load %arg8[%c0_17, %c0_18, %c0_19, %c0_20] : memref<1x4x8x8xbf16, #tpu.memory_space<vmem>>, vector<1x1x8x8xbf16>
    %38 = vector.shape_cast %37 : vector<1x1x8x8xbf16> to vector<8x8xbf16>
    %39 = vector.shape_cast %36 : vector<8x8xbf16> to vector<1x1x8x8xbf16>
    tpu.vector_store %arg8[%c0_17, %c0_18, %c0_19, %c0_20], %39 {strides = array<i32>} : memref<1x4x8x8xbf16, #tpu.memory_space<vmem>>, vector<1x1x8x8xbf16>,
    %40 = vector.extract_strided_slice %32 {offsets = [0, 32], sizes = [8, 8], strides = [1, 1]} : vector<8x96xf32> to vector<8x8xf32>
    %41 = arith.truncf %40 : vector<8x8xf32> to vector<8x8xbf16>
    %c0_21 = arith.constant 0 : index
    %c0_22 = arith.constant 0 : index
    %c0_23 = arith.constant 0 : index
    %c0_24 = arith.constant 0 : index
    %42 = vector.load %arg9[%c0_21, %c0_22, %c0_23, %c0_24] : memref<1x4x8x8xbf16, #tpu.memory_space<vmem>>, vector<1x1x8x8xbf16>
    %43 = vector.shape_cast %42 : vector<1x1x8x8xbf16> to vector<8x8xbf16>
    %44 = vector.shape_cast %41 : vector<8x8xbf16> to vector<1x1x8x8xbf16>
    tpu.vector_store %arg9[%c0_21, %c0_22, %c0_23, %c0_24], %44 {strides = array<i32>} : memref<1x4x8x8xbf16, #tpu.memory_space<vmem>>, vector<1x1x8x8xbf16>,
    %45 = vector.extract_strided_slice %32 {offsets = [0, 64], sizes = [8, 8], strides = [1, 1]} : vector<8x96xf32> to vector<8x8xf32>
    %46 = arith.truncf %45 : vector<8x8xf32> to vector<8x8xbf16>
    %c0_25 = arith.constant 0 : index
    %c0_26 = arith.constant 0 : index
    %c0_27 = arith.constant 0 : index
    %c0_28 = arith.constant 0 : index
    %47 = vector.load %arg10[%c0_25, %c0_26, %c0_27, %c0_28] : memref<1x4x8x8xbf16, #tpu.memory_space<vmem>>, vector<1x1x8x8xbf16>
    %48 = vector.shape_cast %47 : vector<1x1x8x8xbf16> to vector<8x8xbf16>
    %49 = vector.shape_cast %46 : vector<8x8xbf16> to vector<1x1x8x8xbf16>
    tpu.vector_store %arg10[%c0_25, %c0_26, %c0_27, %c0_28], %49 {strides = array<i32>} : memref<1x4x8x8xbf16, #tpu.memory_space<vmem>>, vector<1x1x8x8xbf16>,
    %50 = vector.extract_strided_slice %32 {offsets = [0, 8], sizes = [8, 8], strides = [1, 1]} : vector<8x96xf32> to vector<8x8xf32>
    %cst_29 = arith.constant 0.353553385 : f32
    %51 = vector.broadcast %cst_29 : f32 to vector<8x8xf32>
    %52 = arith.mulf %50, %51 : vector<8x8xf32>
    %53 = arith.truncf %52 : vector<8x8xf32> to vector<8x8xbf16>
    %c0_30 = arith.constant 0 : index
    %c1 = arith.constant 1 : index
    %c0_31 = arith.constant 0 : index
    %c0_32 = arith.constant 0 : index
    %54 = vector.load %arg8[%c0_30, %c1, %c0_31, %c0_32] : memref<1x4x8x8xbf16, #tpu.memory_space<vmem>>, vector<1x1x8x8xbf16>
    %55 = vector.shape_cast %54 : vector<1x1x8x8xbf16> to vector<8x8xbf16>
    %56 = vector.shape_cast %53 : vector<8x8xbf16> to vector<1x1x8x8xbf16>
    tpu.vector_store %arg8[%c0_30, %c1, %c0_31, %c0_32], %56 {strides = array<i32>} : memref<1x4x8x8xbf16, #tpu.memory_space<vmem>>, vector<1x1x8x8xbf16>,
    %57 = vector.extract_strided_slice %32 {offsets = [0, 40], sizes = [8, 8], strides = [1, 1]} : vector<8x96xf32> to vector<8x8xf32>
    %58 = arith.truncf %57 : vector<8x8xf32> to vector<8x8xbf16>
    %c0_33 = arith.constant 0 : index
    %c1_34 = arith.constant 1 : index
    %c0_35 = arith.constant 0 : index
    %c0_36 = arith.constant 0 : index
    %59 = vector.load %arg9[%c0_33, %c1_34, %c0_35, %c0_36] : memref<1x4x8x8xbf16, #tpu.memory_space<vmem>>, vector<1x1x8x8xbf16>
    %60 = vector.shape_cast %59 : vector<1x1x8x8xbf16> to vector<8x8xbf16>
    %61 = vector.shape_cast %58 : vector<8x8xbf16> to vector<1x1x8x8xbf16>
    tpu.vector_store %arg9[%c0_33, %c1_34, %c0_35, %c0_36], %61 {strides = array<i32>} : memref<1x4x8x8xbf16, #tpu.memory_space<vmem>>, vector<1x1x8x8xbf16>,
    %62 = vector.extract_strided_slice %32 {offsets = [0, 72], sizes = [8, 8], strides = [1, 1]} : vector<8x96xf32> to vector<8x8xf32>
    %63 = arith.truncf %62 : vector<8x8xf32> to vector<8x8xbf16>
    %c0_37 = arith.constant 0 : index
    %c1_38 = arith.constant 1 : index
    %c0_39 = arith.constant 0 : index
    %c0_40 = arith.constant 0 : index
    %64 = vector.load %arg10[%c0_37, %c1_38, %c0_39, %c0_40] : memref<1x4x8x8xbf16, #tpu.memory_space<vmem>>, vector<1x1x8x8xbf16>
    %65 = vector.shape_cast %64 : vector<1x1x8x8xbf16> to vector<8x8xbf16>
    %66 = vector.shape_cast %63 : vector<8x8xbf16> to vector<1x1x8x8xbf16>
    tpu.vector_store %arg10[%c0_37, %c1_38, %c0_39, %c0_40], %66 {strides = array<i32>} : memref<1x4x8x8xbf16, #tpu.memory_space<vmem>>, vector<1x1x8x8xbf16>,
    %67 = vector.extract_strided_slice %32 {offsets = [0, 16], sizes = [8, 8], strides = [1, 1]} : vector<8x96xf32> to vector<8x8xf32>
    %cst_41 = arith.constant 0.353553385 : f32
    %68 = vector.broadcast %cst_41 : f32 to vector<8x8xf32>
    %69 = arith.mulf %67, %68 : vector<8x8xf32>
    %70 = arith.truncf %69 : vector<8x8xf32> to vector<8x8xbf16>
    %c0_42 = arith.constant 0 : index
    %c2 = arith.constant 2 : index
    %c0_43 = arith.constant 0 : index
    %c0_44 = arith.constant 0 : index
    %71 = vector.load %arg8[%c0_42, %c2, %c0_43, %c0_44] : memref<1x4x8x8xbf16, #tpu.memory_space<vmem>>, vector<1x1x8x8xbf16>
    %72 = vector.shape_cast %71 : vector<1x1x8x8xbf16> to vector<8x8xbf16>
    %73 = vector.shape_cast %70 : vector<8x8xbf16> to vector<1x1x8x8xbf16>
    tpu.vector_store %arg8[%c0_42, %c2, %c0_43, %c0_44], %73 {strides = array<i32>} : memref<1x4x8x8xbf16, #tpu.memory_space<vmem>>, vector<1x1x8x8xbf16>,
    %74 = vector.extract_strided_slice %32 {offsets = [0, 48], sizes = [8, 8], strides = [1, 1]} : vector<8x96xf32> to vector<8x8xf32>
    %75 = arith.truncf %74 : vector<8x8xf32> to vector<8x8xbf16>
    %c0_45 = arith.constant 0 : index
    %c2_46 = arith.constant 2 : index
    %c0_47 = arith.constant 0 : index
    %c0_48 = arith.constant 0 : index
    %76 = vector.load %arg9[%c0_45, %c2_46, %c0_47, %c0_48] : memref<1x4x8x8xbf16, #tpu.memory_space<vmem>>, vector<1x1x8x8xbf16>
    %77 = vector.shape_cast %76 : vector<1x1x8x8xbf16> to vector<8x8xbf16>
    %78 = vector.shape_cast %75 : vector<8x8xbf16> to vector<1x1x8x8xbf16>
    tpu.vector_store %arg9[%c0_45, %c2_46, %c0_47, %c0_48], %78 {strides = array<i32>} : memref<1x4x8x8xbf16, #tpu.memory_space<vmem>>, vector<1x1x8x8xbf16>,
    %79 = vector.extract_strided_slice %32 {offsets = [0, 80], sizes = [8, 8], strides = [1, 1]} : vector<8x96xf32> to vector<8x8xf32>
    %80 = arith.truncf %79 : vector<8x8xf32> to vector<8x8xbf16>
    %c0_49 = arith.constant 0 : index
    %c2_50 = arith.constant 2 : index
    %c0_51 = arith.constant 0 : index
    %c0_52 = arith.constant 0 : index
    %81 = vector.load %arg10[%c0_49, %c2_50, %c0_51, %c0_52] : memref<1x4x8x8xbf16, #tpu.memory_space<vmem>>, vector<1x1x8x8xbf16>
    %82 = vector.shape_cast %81 : vector<1x1x8x8xbf16> to vector<8x8xbf16>
    %83 = vector.shape_cast %80 : vector<8x8xbf16> to vector<1x1x8x8xbf16>
    tpu.vector_store %arg10[%c0_49, %c2_50, %c0_51, %c0_52], %83 {strides = array<i32>} : memref<1x4x8x8xbf16, #tpu.memory_space<vmem>>, vector<1x1x8x8xbf16>,
    %84 = vector.extract_strided_slice %32 {offsets = [0, 24], sizes = [8, 8], strides = [1, 1]} : vector<8x96xf32> to vector<8x8xf32>
    %cst_53 = arith.constant 0.353553385 : f32
    %85 = vector.broadcast %cst_53 : f32 to vector<8x8xf32>
    %86 = arith.mulf %84, %85 : vector<8x8xf32>
    %87 = arith.truncf %86 : vector<8x8xf32> to vector<8x8xbf16>
    %c0_54 = arith.constant 0 : index
    %c3 = arith.constant 3 : index
    %c0_55 = arith.constant 0 : index
    %c0_56 = arith.constant 0 : index
    %88 = vector.load %arg8[%c0_54, %c3, %c0_55, %c0_56] : memref<1x4x8x8xbf16, #tpu.memory_space<vmem>>, vector<1x1x8x8xbf16>
    %89 = vector.shape_cast %88 : vector<1x1x8x8xbf16> to vector<8x8xbf16>
    %90 = vector.shape_cast %87 : vector<8x8xbf16> to vector<1x1x8x8xbf16>
    tpu.vector_store %arg8[%c0_54, %c3, %c0_55, %c0_56], %90 {strides = array<i32>} : memref<1x4x8x8xbf16, #tpu.memory_space<vmem>>, vector<1x1x8x8xbf16>,
    %91 = vector.extract_strided_slice %32 {offsets = [0, 56], sizes = [8, 8], strides = [1, 1]} : vector<8x96xf32> to vector<8x8xf32>
    %92 = arith.truncf %91 : vector<8x8xf32> to vector<8x8xbf16>
    %c0_57 = arith.constant 0 : index
    %c3_58 = arith.constant 3 : index
    %c0_59 = arith.constant 0 : index
    %c0_60 = arith.constant 0 : index
    %93 = vector.load %arg9[%c0_57, %c3_58, %c0_59, %c0_60] : memref<1x4x8x8xbf16, #tpu.memory_space<vmem>>, vector<1x1x8x8xbf16>
    %94 = vector.shape_cast %93 : vector<1x1x8x8xbf16> to vector<8x8xbf16>
    %95 = vector.shape_cast %92 : vector<8x8xbf16> to vector<1x1x8x8xbf16>
    tpu.vector_store %arg9[%c0_57, %c3_58, %c0_59, %c0_60], %95 {strides = array<i32>} : memref<1x4x8x8xbf16, #tpu.memory_space<vmem>>, vector<1x1x8x8xbf16>,
    %96 = vector.extract_strided_slice %32 {offsets = [0, 88], sizes = [8, 8], strides = [1, 1]} : vector<8x96xf32> to vector<8x8xf32>
    %97 = arith.truncf %96 : vector<8x8xf32> to vector<8x8xbf16>
    %c0_61 = arith.constant 0 : index
    %c3_62 = arith.constant 3 : index
    %c0_63 = arith.constant 0 : index
    %c0_64 = arith.constant 0 : index
    %98 = vector.load %arg10[%c0_61, %c3_62, %c0_63, %c0_64] : memref<1x4x8x8xbf16, #tpu.memory_space<vmem>>, vector<1x1x8x8xbf16>
    %99 = vector.shape_cast %98 : vector<1x1x8x8xbf16> to vector<8x8xbf16>
    %100 = vector.shape_cast %97 : vector<8x8xbf16> to vector<1x1x8x8xbf16>
    tpu.vector_store %arg10[%c0_61, %c3_62, %c0_63, %c0_64], %100 {strides = array<i32>} : memref<1x4x8x8xbf16, #tpu.memory_space<vmem>>, vector<1x1x8x8xbf16>,
    return
  }
  func.func @transform_0(%arg0: i32, %arg1: i32) -> (i32, i32, i32) {
    %c0_i32 = arith.constant 0 : i32
    %c0_i32_0 = arith.constant 0 : i32
    return %arg0, %arg1, %c0_i32 : i32, i32, i32
  }
  func.func @transform_1(%arg0: i32, %arg1: i32) -> (i32, i32) {
    %c0_i32 = arith.constant 0 : i32
    %c0_i32_0 = arith.constant 0 : i32
    return %arg1, %c0_i32 : i32, i32
  }
  func.func @transform_2(%arg0: i32, %arg1: i32) -> (i32, i32) {
    %c0_i32 = arith.constant 0 : i32
    %c0_i32_0 = arith.constant 0 : i32
    return %arg1, %c0_i32 : i32, i32
  }
  func.func @transform_3(%arg0: i32, %arg1: i32) -> (i32, i32) {
    %c0_i32 = arith.constant 0 : i32
    %c0_i32_0 = arith.constant 0 : i32
    %c0_i32_1 = arith.constant 0 : i32
    return %c0_i32, %c0_i32_0 : i32, i32
  }
  func.func @transform_4(%arg0: i32, %arg1: i32) -> (i32, i32) {
    %c0_i32 = arith.constant 0 : i32
    %c0_i32_0 = arith.constant 0 : i32
    %c0_i32_1 = arith.constant 0 : i32
    return %c0_i32, %c0_i32_0 : i32, i32
  }
  func.func @transform_5(%arg0: i32, %arg1: i32) -> (i32, i32, i32) {
    %c0_i32 = arith.constant 0 : i32
    %c0_i32_0 = arith.constant 0 : i32
    return %arg0, %arg1, %c0_i32 : i32, i32, i32
  }
  func.func @transform_6(%arg0: i32, %arg1: i32) -> (i32, i32, i32, i32) {
    %c0_i32 = arith.constant 0 : i32
    %c0_i32_0 = arith.constant 0 : i32
    %c0_i32_1 = arith.constant 0 : i32
    return %arg0, %c0_i32, %arg1, %c0_i32_0 : i32, i32, i32, i32
  }
  func.func @transform_7(%arg0: i32, %arg1: i32) -> (i32, i32, i32, i32) {
    %c0_i32 = arith.constant 0 : i32
    %c0_i32_0 = arith.constant 0 : i32
    %c0_i32_1 = arith.constant 0 : i32
    return %arg0, %c0_i32, %arg1, %c0_i32_0 : i32, i32, i32, i32
  }
  func.func @transform_8(%arg0: i32, %arg1: i32) -> (i32, i32, i32, i32) {
    %c0_i32 = arith.constant 0 : i32
    %c0_i32_0 = arith.constant 0 : i32
    %c0_i32_1 = arith.constant 0 : i32
    return %arg0, %c0_i32, %arg1, %c0_i32_0 : i32, i32, i32, i32
  }
}

module attributes {stable_mosaic.version = 11 : i64} {
  func.func @outproj_ffn_kernel(%arg0: i32, %arg1: i32, %arg2: memref<1x8x32xbf16, #tpu.memory_space<vmem>>, %arg3: memref<1x4x8x8xbf16, #tpu.memory_space<vmem>>, %arg4: memref<1x32xf32, #tpu.memory_space<vmem>>, %arg5: memref<32x32xbf16, #tpu.memory_space<vmem>>, %arg6: memref<32x32xbf16, #tpu.memory_space<vmem>>, %arg7: memref<32x32xbf16, #tpu.memory_space<vmem>>, %arg8: memref<32x32xbf16, #tpu.memory_space<vmem>>, %arg9: memref<1x8x32xbf16, #tpu.memory_space<vmem>>) attributes {dimension_semantics = [#tpu.dimension_semantics<parallel>, #tpu.dimension_semantics<parallel>], iteration_bounds = array<i64: 2, 1>, scalar_prefetch = 0 : i64, scratch_operands = 0 : i64, tpu.core_type = #tpu.core_type<tc>, window_params = [{transform_indices = @transform_0, window_bounds = array<i64: 1, 8, 32>}, {transform_indices = @transform_1, window_bounds = array<i64: 1, 4, 8, 8>}, {pipeline_mode = #tpu.pipeline_mode<synchronous>, transform_indices = @transform_2, window_bounds = array<i64: 1, 32>}, {pipeline_mode = #tpu.pipeline_mode<synchronous>, transform_indices = @transform_3, window_bounds = array<i64: 32, 32>}, {pipeline_mode = #tpu.pipeline_mode<synchronous>, transform_indices = @transform_4, window_bounds = array<i64: 32, 32>}, {pipeline_mode = #tpu.pipeline_mode<synchronous>, transform_indices = @transform_5, window_bounds = array<i64: 32, 32>}, {pipeline_mode = #tpu.pipeline_mode<synchronous>, transform_indices = @transform_6, window_bounds = array<i64: 32, 32>}, {transform_indices = @transform_7, window_bounds = array<i64: 1, 8, 32>}]} {
    %c0 = arith.constant 0 : index
    %c0_0 = arith.constant 0 : index
    %c0_1 = arith.constant 0 : index
    %0 = vector.load %arg2[%c0, %c0_0, %c0_1] : memref<1x8x32xbf16, #tpu.memory_space<vmem>>, vector<1x8x32xbf16>
    %1 = vector.shape_cast %0 : vector<1x8x32xbf16> to vector<8x32xbf16>
    %2 = arith.extf %1 : vector<8x32xbf16> to vector<8x32xf32>
    %c0_2 = arith.constant 0 : index
    %c0_3 = arith.constant 0 : index
    %c0_4 = arith.constant 0 : index
    %c0_5 = arith.constant 0 : index
    %3 = vector.load %arg3[%c0_2, %c0_3, %c0_4, %c0_5] : memref<1x4x8x8xbf16, #tpu.memory_space<vmem>>, vector<1x1x8x8xbf16>
    %4 = vector.shape_cast %3 : vector<1x1x8x8xbf16> to vector<8x8xbf16>
    %c0_6 = arith.constant 0 : index
    %c1 = arith.constant 1 : index
    %c0_7 = arith.constant 0 : index
    %c0_8 = arith.constant 0 : index
    %5 = vector.load %arg3[%c0_6, %c1, %c0_7, %c0_8] : memref<1x4x8x8xbf16, #tpu.memory_space<vmem>>, vector<1x1x8x8xbf16>
    %6 = vector.shape_cast %5 : vector<1x1x8x8xbf16> to vector<8x8xbf16>
    %c0_9 = arith.constant 0 : index
    %c2 = arith.constant 2 : index
    %c0_10 = arith.constant 0 : index
    %c0_11 = arith.constant 0 : index
    %7 = vector.load %arg3[%c0_9, %c2, %c0_10, %c0_11] : memref<1x4x8x8xbf16, #tpu.memory_space<vmem>>, vector<1x1x8x8xbf16>
    %8 = vector.shape_cast %7 : vector<1x1x8x8xbf16> to vector<8x8xbf16>
    %c0_12 = arith.constant 0 : index
    %c3 = arith.constant 3 : index
    %c0_13 = arith.constant 0 : index
    %c0_14 = arith.constant 0 : index
    %9 = vector.load %arg3[%c0_12, %c3, %c0_13, %c0_14] : memref<1x4x8x8xbf16, #tpu.memory_space<vmem>>, vector<1x1x8x8xbf16>
    %10 = vector.shape_cast %9 : vector<1x1x8x8xbf16> to vector<8x8xbf16>
    %11 = tpu.concatenate %4, %6, %8, %10 in 1 : vector<8x8xbf16>, vector<8x8xbf16>, vector<8x8xbf16>, vector<8x8xbf16> -> vector<8x32xbf16>
    %c0_15 = arith.constant 0 : index
    %c0_16 = arith.constant 0 : index
    %12 = vector.load %arg5[%c0_15, %c0_16] : memref<32x32xbf16, #tpu.memory_space<vmem>>, vector<32x32xbf16>
    %cst = arith.constant dense<0.000000e+00> : vector<8x32xf32>
    %13 = tpu.matmul %11, %12, %cst {dimension_numbers = #tpu.dot_dimension_numbers<[1], [0], [0], [1], [0, 0, 1, 1], [], []>} : vector<8x32xbf16>, vector<32x32xbf16>, vector<8x32xf32> -> vector<8x32xf32>
    %14 = arith.addf %2, %13 : vector<8x32xf32>
    %c0_17 = arith.constant 0 : index
    %c0_18 = arith.constant 0 : index
    %15 = vector.load %arg4[%c0_17, %c0_18] : memref<1x32xf32, #tpu.memory_space<vmem>>, vector<1x32xf32>
    %16 = arith.mulf %14, %14 : vector<8x32xf32>
    %cst_19 = arith.constant dense<0.000000e+00> : vector<8xf32>
    %17 = vector.multi_reduction <add>, %16, %cst_19 [1] : vector<8x32xf32> to vector<8xf32>
    %18 = vector.shape_cast %17 : vector<8xf32> to vector<8x1xf32>
    %cst_20 = arith.constant 3.200000e+01 : f32
    %19 = vector.broadcast %cst_20 : f32 to vector<8x1xf32>
    %20 = arith.divf %18, %19 : vector<8x1xf32>
    %cst_21 = arith.constant 9.99999997E-7 : f32
    %21 = vector.broadcast %cst_21 : f32 to vector<8x1xf32>
    %22 = arith.addf %20, %21 : vector<8x1xf32>
    %23 = math.rsqrt %22 : vector<8x1xf32>
    %24 = vector.broadcast %23 : vector<8x1xf32> to vector<8x32xf32>
    %25 = arith.mulf %14, %24 : vector<8x32xf32>
    %26 = vector.broadcast %15 : vector<1x32xf32> to vector<8x32xf32>
    %27 = arith.mulf %25, %26 : vector<8x32xf32>
    %28 = arith.truncf %27 : vector<8x32xf32> to vector<8x32xbf16>
    %c0_22 = arith.constant 0 : index
    %c0_23 = arith.constant 0 : index
    %29 = vector.load %arg6[%c0_22, %c0_23] : memref<32x32xbf16, #tpu.memory_space<vmem>>, vector<32x32xbf16>
    %cst_24 = arith.constant dense<0.000000e+00> : vector<8x32xf32>
    %30 = tpu.matmul %28, %29, %cst_24 {dimension_numbers = #tpu.dot_dimension_numbers<[1], [0], [0], [1], [0, 0, 1, 1], [], []>} : vector<8x32xbf16>, vector<32x32xbf16>, vector<8x32xf32> -> vector<8x32xf32>
    %cst_25 = arith.constant 0.000000e+00 : f32
    %31 = vector.broadcast %cst_25 : f32 to vector<8x32xf32>
    %32 = arith.maximumf %30, %31 : vector<8x32xf32>
    %33 = arith.truncf %32 : vector<8x32xf32> to vector<8x32xbf16>
    %c0_26 = arith.constant 0 : index
    %c0_27 = arith.constant 0 : index
    %34 = vector.load %arg7[%c0_26, %c0_27] : memref<32x32xbf16, #tpu.memory_space<vmem>>, vector<32x32xbf16>
    %cst_28 = arith.constant dense<0.000000e+00> : vector<8x32xf32>
    %35 = tpu.matmul %33, %34, %cst_28 {dimension_numbers = #tpu.dot_dimension_numbers<[1], [0], [0], [1], [0, 0, 1, 1], [], []>} : vector<8x32xbf16>, vector<32x32xbf16>, vector<8x32xf32> -> vector<8x32xf32>
    %36 = arith.mulf %32, %35 : vector<8x32xf32>
    %37 = arith.truncf %36 : vector<8x32xf32> to vector<8x32xbf16>
    %c0_29 = arith.constant 0 : index
    %c0_30 = arith.constant 0 : index
    %38 = vector.load %arg8[%c0_29, %c0_30] : memref<32x32xbf16, #tpu.memory_space<vmem>>, vector<32x32xbf16>
    %cst_31 = arith.constant dense<0.000000e+00> : vector<8x32xf32>
    %39 = tpu.matmul %37, %38, %cst_31 {dimension_numbers = #tpu.dot_dimension_numbers<[1], [0], [0], [1], [0, 0, 1, 1], [], []>} : vector<8x32xbf16>, vector<32x32xbf16>, vector<8x32xf32> -> vector<8x32xf32>
    %40 = arith.addf %14, %39 : vector<8x32xf32>
    %41 = arith.truncf %40 : vector<8x32xf32> to vector<8x32xbf16>
    %c0_32 = arith.constant 0 : index
    %c0_33 = arith.constant 0 : index
    %c0_34 = arith.constant 0 : index
    %42 = vector.load %arg9[%c0_32, %c0_33, %c0_34] : memref<1x8x32xbf16, #tpu.memory_space<vmem>>, vector<1x8x32xbf16>
    %43 = vector.shape_cast %42 : vector<1x8x32xbf16> to vector<8x32xbf16>
    %44 = vector.shape_cast %41 : vector<8x32xbf16> to vector<1x8x32xbf16>
    tpu.vector_store %arg9[%c0_32, %c0_33, %c0_34], %44 {strides = array<i32>} : memref<1x8x32xbf16, #tpu.memory_space<vmem>>, vector<1x8x32xbf16>,
    return
  }
  func.func @transform_0(%arg0: i32, %arg1: i32) -> (i32, i32, i32) {
    %c0_i32 = arith.constant 0 : i32
    %c0_i32_0 = arith.constant 0 : i32
    return %arg0, %arg1, %c0_i32 : i32, i32, i32
  }
  func.func @transform_1(%arg0: i32, %arg1: i32) -> (i32, i32, i32, i32) {
    %c0_i32 = arith.constant 0 : i32
    %c0_i32_0 = arith.constant 0 : i32
    %c0_i32_1 = arith.constant 0 : i32
    return %arg0, %c0_i32, %arg1, %c0_i32_0 : i32, i32, i32, i32
  }
  func.func @transform_2(%arg0: i32, %arg1: i32) -> (i32, i32) {
    %c0_i32 = arith.constant 0 : i32
    %c0_i32_0 = arith.constant 0 : i32
    %c0_i32_1 = arith.constant 0 : i32
    return %c0_i32, %c0_i32_0 : i32, i32
  }
  func.func @transform_3(%arg0: i32, %arg1: i32) -> (i32, i32) {
    %c0_i32 = arith.constant 0 : i32
    %c0_i32_0 = arith.constant 0 : i32
    %c0_i32_1 = arith.constant 0 : i32
    return %c0_i32, %c0_i32_0 : i32, i32
  }
  func.func @transform_4(%arg0: i32, %arg1: i32) -> (i32, i32) {
    %c0_i32 = arith.constant 0 : i32
    %c0_i32_0 = arith.constant 0 : i32
    %c0_i32_1 = arith.constant 0 : i32
    return %c0_i32, %c0_i32_0 : i32, i32
  }
  func.func @transform_5(%arg0: i32, %arg1: i32) -> (i32, i32) {
    %c0_i32 = arith.constant 0 : i32
    %c0_i32_0 = arith.constant 0 : i32
    %c0_i32_1 = arith.constant 0 : i32
    return %c0_i32, %c0_i32_0 : i32, i32
  }
  func.func @transform_6(%arg0: i32, %arg1: i32) -> (i32, i32) {
    %c0_i32 = arith.constant 0 : i32
    %c0_i32_0 = arith.constant 0 : i32
    %c0_i32_1 = arith.constant 0 : i32
    return %c0_i32, %c0_i32_0 : i32, i32
  }
  func.func @transform_7(%arg0: i32, %arg1: i32) -> (i32, i32, i32) {
    %c0_i32 = arith.constant 0 : i32
    %c0_i32_0 = arith.constant 0 : i32
    return %arg0, %arg1, %c0_i32 : i32, i32, i32
  }
}

module attributes {stable_mosaic.version = 11 : i64} {
  func.func @rmsnorm_qkv_kernel(%arg0: i32, %arg1: i32, %arg2: memref<1x8x32xbf16, #tpu.memory_space<vmem>>, %arg3: memref<1x32xf32, #tpu.memory_space<vmem>>, %arg4: memref<32x96xbf16, #tpu.memory_space<vmem>>, %arg5: memref<1x4x8x8xbf16, #tpu.memory_space<vmem>>, %arg6: memref<1x4x8x8xbf16, #tpu.memory_space<vmem>>, %arg7: memref<1x4x8x8xbf16, #tpu.memory_space<vmem>>) attributes {dimension_semantics = [#tpu.dimension_semantics<parallel>, #tpu.dimension_semantics<parallel>], iteration_bounds = array<i64: 2, 1>, scalar_prefetch = 0 : i64, scratch_operands = 0 : i64, tpu.core_type = #tpu.core_type<tc>, window_params = [{transform_indices = @transform_0, window_bounds = array<i64: 1, 8, 32>}, {pipeline_mode = #tpu.pipeline_mode<synchronous>, transform_indices = @transform_1, window_bounds = array<i64: 1, 32>}, {pipeline_mode = #tpu.pipeline_mode<synchronous>, transform_indices = @transform_2, window_bounds = array<i64: 32, 96>}, {transform_indices = @transform_3, window_bounds = array<i64: 1, 4, 8, 8>}, {transform_indices = @transform_4, window_bounds = array<i64: 1, 4, 8, 8>}, {transform_indices = @transform_5, window_bounds = array<i64: 1, 4, 8, 8>}]} {
    %c0 = arith.constant 0 : index
    %c0_0 = arith.constant 0 : index
    %c0_1 = arith.constant 0 : index
    %0 = vector.load %arg2[%c0, %c0_0, %c0_1] : memref<1x8x32xbf16, #tpu.memory_space<vmem>>, vector<1x8x32xbf16>
    %1 = vector.shape_cast %0 : vector<1x8x32xbf16> to vector<8x32xbf16>
    %2 = arith.extf %1 : vector<8x32xbf16> to vector<8x32xf32>
    %c0_2 = arith.constant 0 : index
    %c0_3 = arith.constant 0 : index
    %3 = vector.load %arg3[%c0_2, %c0_3] : memref<1x32xf32, #tpu.memory_space<vmem>>, vector<1x32xf32>
    %4 = arith.mulf %2, %2 : vector<8x32xf32>
    %cst = arith.constant dense<0.000000e+00> : vector<8xf32>
    %5 = vector.multi_reduction <add>, %4, %cst [1] : vector<8x32xf32> to vector<8xf32>
    %6 = vector.shape_cast %5 : vector<8xf32> to vector<8x1xf32>
    %cst_4 = arith.constant 3.200000e+01 : f32
    %7 = vector.broadcast %cst_4 : f32 to vector<8x1xf32>
    %8 = arith.divf %6, %7 : vector<8x1xf32>
    %cst_5 = arith.constant 9.99999997E-7 : f32
    %9 = vector.broadcast %cst_5 : f32 to vector<8x1xf32>
    %10 = arith.addf %8, %9 : vector<8x1xf32>
    %11 = math.rsqrt %10 : vector<8x1xf32>
    %12 = vector.broadcast %11 : vector<8x1xf32> to vector<8x32xf32>
    %13 = arith.mulf %2, %12 : vector<8x32xf32>
    %14 = vector.broadcast %3 : vector<1x32xf32> to vector<8x32xf32>
    %15 = arith.mulf %13, %14 : vector<8x32xf32>
    %16 = arith.truncf %15 : vector<8x32xf32> to vector<8x32xbf16>
    %c0_6 = arith.constant 0 : index
    %c0_7 = arith.constant 0 : index
    %17 = vector.load %arg4[%c0_6, %c0_7] : memref<32x96xbf16, #tpu.memory_space<vmem>>, vector<32x96xbf16>
    %cst_8 = arith.constant dense<0.000000e+00> : vector<8x96xf32>
    %18 = tpu.matmul %16, %17, %cst_8 {dimension_numbers = #tpu.dot_dimension_numbers<[1], [0], [0], [1], [0, 0, 1, 1], [], []>} : vector<8x32xbf16>, vector<32x96xbf16>, vector<8x96xf32> -> vector<8x96xf32>
    %19 = vector.extract_strided_slice %18 {offsets = [0, 0], sizes = [8, 8], strides = [1, 1]} : vector<8x96xf32> to vector<8x8xf32>
    %cst_9 = arith.constant 0.353553385 : f32
    %20 = vector.broadcast %cst_9 : f32 to vector<8x8xf32>
    %21 = arith.mulf %19, %20 : vector<8x8xf32>
    %22 = arith.truncf %21 : vector<8x8xf32> to vector<8x8xbf16>
    %c0_10 = arith.constant 0 : index
    %c0_11 = arith.constant 0 : index
    %c0_12 = arith.constant 0 : index
    %c0_13 = arith.constant 0 : index
    %23 = vector.load %arg5[%c0_10, %c0_11, %c0_12, %c0_13] : memref<1x4x8x8xbf16, #tpu.memory_space<vmem>>, vector<1x1x8x8xbf16>
    %24 = vector.shape_cast %23 : vector<1x1x8x8xbf16> to vector<8x8xbf16>
    %25 = vector.shape_cast %22 : vector<8x8xbf16> to vector<1x1x8x8xbf16>
    tpu.vector_store %arg5[%c0_10, %c0_11, %c0_12, %c0_13], %25 {strides = array<i32>} : memref<1x4x8x8xbf16, #tpu.memory_space<vmem>>, vector<1x1x8x8xbf16>,
    %26 = vector.extract_strided_slice %18 {offsets = [0, 32], sizes = [8, 8], strides = [1, 1]} : vector<8x96xf32> to vector<8x8xf32>
    %27 = arith.truncf %26 : vector<8x8xf32> to vector<8x8xbf16>
    %c0_14 = arith.constant 0 : index
    %c0_15 = arith.constant 0 : index
    %c0_16 = arith.constant 0 : index
    %c0_17 = arith.constant 0 : index
    %28 = vector.load %arg6[%c0_14, %c0_15, %c0_16, %c0_17] : memref<1x4x8x8xbf16, #tpu.memory_space<vmem>>, vector<1x1x8x8xbf16>
    %29 = vector.shape_cast %28 : vector<1x1x8x8xbf16> to vector<8x8xbf16>
    %30 = vector.shape_cast %27 : vector<8x8xbf16> to vector<1x1x8x8xbf16>
    tpu.vector_store %arg6[%c0_14, %c0_15, %c0_16, %c0_17], %30 {strides = array<i32>} : memref<1x4x8x8xbf16, #tpu.memory_space<vmem>>, vector<1x1x8x8xbf16>,
    %31 = vector.extract_strided_slice %18 {offsets = [0, 64], sizes = [8, 8], strides = [1, 1]} : vector<8x96xf32> to vector<8x8xf32>
    %32 = arith.truncf %31 : vector<8x8xf32> to vector<8x8xbf16>
    %c0_18 = arith.constant 0 : index
    %c0_19 = arith.constant 0 : index
    %c0_20 = arith.constant 0 : index
    %c0_21 = arith.constant 0 : index
    %33 = vector.load %arg7[%c0_18, %c0_19, %c0_20, %c0_21] : memref<1x4x8x8xbf16, #tpu.memory_space<vmem>>, vector<1x1x8x8xbf16>
    %34 = vector.shape_cast %33 : vector<1x1x8x8xbf16> to vector<8x8xbf16>
    %35 = vector.shape_cast %32 : vector<8x8xbf16> to vector<1x1x8x8xbf16>
    tpu.vector_store %arg7[%c0_18, %c0_19, %c0_20, %c0_21], %35 {strides = array<i32>} : memref<1x4x8x8xbf16, #tpu.memory_space<vmem>>, vector<1x1x8x8xbf16>,
    %36 = vector.extract_strided_slice %18 {offsets = [0, 8], sizes = [8, 8], strides = [1, 1]} : vector<8x96xf32> to vector<8x8xf32>
    %cst_22 = arith.constant 0.353553385 : f32
    %37 = vector.broadcast %cst_22 : f32 to vector<8x8xf32>
    %38 = arith.mulf %36, %37 : vector<8x8xf32>
    %39 = arith.truncf %38 : vector<8x8xf32> to vector<8x8xbf16>
    %c0_23 = arith.constant 0 : index
    %c1 = arith.constant 1 : index
    %c0_24 = arith.constant 0 : index
    %c0_25 = arith.constant 0 : index
    %40 = vector.load %arg5[%c0_23, %c1, %c0_24, %c0_25] : memref<1x4x8x8xbf16, #tpu.memory_space<vmem>>, vector<1x1x8x8xbf16>
    %41 = vector.shape_cast %40 : vector<1x1x8x8xbf16> to vector<8x8xbf16>
    %42 = vector.shape_cast %39 : vector<8x8xbf16> to vector<1x1x8x8xbf16>
    tpu.vector_store %arg5[%c0_23, %c1, %c0_24, %c0_25], %42 {strides = array<i32>} : memref<1x4x8x8xbf16, #tpu.memory_space<vmem>>, vector<1x1x8x8xbf16>,
    %43 = vector.extract_strided_slice %18 {offsets = [0, 40], sizes = [8, 8], strides = [1, 1]} : vector<8x96xf32> to vector<8x8xf32>
    %44 = arith.truncf %43 : vector<8x8xf32> to vector<8x8xbf16>
    %c0_26 = arith.constant 0 : index
    %c1_27 = arith.constant 1 : index
    %c0_28 = arith.constant 0 : index
    %c0_29 = arith.constant 0 : index
    %45 = vector.load %arg6[%c0_26, %c1_27, %c0_28, %c0_29] : memref<1x4x8x8xbf16, #tpu.memory_space<vmem>>, vector<1x1x8x8xbf16>
    %46 = vector.shape_cast %45 : vector<1x1x8x8xbf16> to vector<8x8xbf16>
    %47 = vector.shape_cast %44 : vector<8x8xbf16> to vector<1x1x8x8xbf16>
    tpu.vector_store %arg6[%c0_26, %c1_27, %c0_28, %c0_29], %47 {strides = array<i32>} : memref<1x4x8x8xbf16, #tpu.memory_space<vmem>>, vector<1x1x8x8xbf16>,
    %48 = vector.extract_strided_slice %18 {offsets = [0, 72], sizes = [8, 8], strides = [1, 1]} : vector<8x96xf32> to vector<8x8xf32>
    %49 = arith.truncf %48 : vector<8x8xf32> to vector<8x8xbf16>
    %c0_30 = arith.constant 0 : index
    %c1_31 = arith.constant 1 : index
    %c0_32 = arith.constant 0 : index
    %c0_33 = arith.constant 0 : index
    %50 = vector.load %arg7[%c0_30, %c1_31, %c0_32, %c0_33] : memref<1x4x8x8xbf16, #tpu.memory_space<vmem>>, vector<1x1x8x8xbf16>
    %51 = vector.shape_cast %50 : vector<1x1x8x8xbf16> to vector<8x8xbf16>
    %52 = vector.shape_cast %49 : vector<8x8xbf16> to vector<1x1x8x8xbf16>
    tpu.vector_store %arg7[%c0_30, %c1_31, %c0_32, %c0_33], %52 {strides = array<i32>} : memref<1x4x8x8xbf16, #tpu.memory_space<vmem>>, vector<1x1x8x8xbf16>,
    %53 = vector.extract_strided_slice %18 {offsets = [0, 16], sizes = [8, 8], strides = [1, 1]} : vector<8x96xf32> to vector<8x8xf32>
    %cst_34 = arith.constant 0.353553385 : f32
    %54 = vector.broadcast %cst_34 : f32 to vector<8x8xf32>
    %55 = arith.mulf %53, %54 : vector<8x8xf32>
    %56 = arith.truncf %55 : vector<8x8xf32> to vector<8x8xbf16>
    %c0_35 = arith.constant 0 : index
    %c2 = arith.constant 2 : index
    %c0_36 = arith.constant 0 : index
    %c0_37 = arith.constant 0 : index
    %57 = vector.load %arg5[%c0_35, %c2, %c0_36, %c0_37] : memref<1x4x8x8xbf16, #tpu.memory_space<vmem>>, vector<1x1x8x8xbf16>
    %58 = vector.shape_cast %57 : vector<1x1x8x8xbf16> to vector<8x8xbf16>
    %59 = vector.shape_cast %56 : vector<8x8xbf16> to vector<1x1x8x8xbf16>
    tpu.vector_store %arg5[%c0_35, %c2, %c0_36, %c0_37], %59 {strides = array<i32>} : memref<1x4x8x8xbf16, #tpu.memory_space<vmem>>, vector<1x1x8x8xbf16>,
    %60 = vector.extract_strided_slice %18 {offsets = [0, 48], sizes = [8, 8], strides = [1, 1]} : vector<8x96xf32> to vector<8x8xf32>
    %61 = arith.truncf %60 : vector<8x8xf32> to vector<8x8xbf16>
    %c0_38 = arith.constant 0 : index
    %c2_39 = arith.constant 2 : index
    %c0_40 = arith.constant 0 : index
    %c0_41 = arith.constant 0 : index
    %62 = vector.load %arg6[%c0_38, %c2_39, %c0_40, %c0_41] : memref<1x4x8x8xbf16, #tpu.memory_space<vmem>>, vector<1x1x8x8xbf16>
    %63 = vector.shape_cast %62 : vector<1x1x8x8xbf16> to vector<8x8xbf16>
    %64 = vector.shape_cast %61 : vector<8x8xbf16> to vector<1x1x8x8xbf16>
    tpu.vector_store %arg6[%c0_38, %c2_39, %c0_40, %c0_41], %64 {strides = array<i32>} : memref<1x4x8x8xbf16, #tpu.memory_space<vmem>>, vector<1x1x8x8xbf16>,
    %65 = vector.extract_strided_slice %18 {offsets = [0, 80], sizes = [8, 8], strides = [1, 1]} : vector<8x96xf32> to vector<8x8xf32>
    %66 = arith.truncf %65 : vector<8x8xf32> to vector<8x8xbf16>
    %c0_42 = arith.constant 0 : index
    %c2_43 = arith.constant 2 : index
    %c0_44 = arith.constant 0 : index
    %c0_45 = arith.constant 0 : index
    %67 = vector.load %arg7[%c0_42, %c2_43, %c0_44, %c0_45] : memref<1x4x8x8xbf16, #tpu.memory_space<vmem>>, vector<1x1x8x8xbf16>
    %68 = vector.shape_cast %67 : vector<1x1x8x8xbf16> to vector<8x8xbf16>
    %69 = vector.shape_cast %66 : vector<8x8xbf16> to vector<1x1x8x8xbf16>
    tpu.vector_store %arg7[%c0_42, %c2_43, %c0_44, %c0_45], %69 {strides = array<i32>} : memref<1x4x8x8xbf16, #tpu.memory_space<vmem>>, vector<1x1x8x8xbf16>,
    %70 = vector.extract_strided_slice %18 {offsets = [0, 24], sizes = [8, 8], strides = [1, 1]} : vector<8x96xf32> to vector<8x8xf32>
    %cst_46 = arith.constant 0.353553385 : f32
    %71 = vector.broadcast %cst_46 : f32 to vector<8x8xf32>
    %72 = arith.mulf %70, %71 : vector<8x8xf32>
    %73 = arith.truncf %72 : vector<8x8xf32> to vector<8x8xbf16>
    %c0_47 = arith.constant 0 : index
    %c3 = arith.constant 3 : index
    %c0_48 = arith.constant 0 : index
    %c0_49 = arith.constant 0 : index
    %74 = vector.load %arg5[%c0_47, %c3, %c0_48, %c0_49] : memref<1x4x8x8xbf16, #tpu.memory_space<vmem>>, vector<1x1x8x8xbf16>
    %75 = vector.shape_cast %74 : vector<1x1x8x8xbf16> to vector<8x8xbf16>
    %76 = vector.shape_cast %73 : vector<8x8xbf16> to vector<1x1x8x8xbf16>
    tpu.vector_store %arg5[%c0_47, %c3, %c0_48, %c0_49], %76 {strides = array<i32>} : memref<1x4x8x8xbf16, #tpu.memory_space<vmem>>, vector<1x1x8x8xbf16>,
    %77 = vector.extract_strided_slice %18 {offsets = [0, 56], sizes = [8, 8], strides = [1, 1]} : vector<8x96xf32> to vector<8x8xf32>
    %78 = arith.truncf %77 : vector<8x8xf32> to vector<8x8xbf16>
    %c0_50 = arith.constant 0 : index
    %c3_51 = arith.constant 3 : index
    %c0_52 = arith.constant 0 : index
    %c0_53 = arith.constant 0 : index
    %79 = vector.load %arg6[%c0_50, %c3_51, %c0_52, %c0_53] : memref<1x4x8x8xbf16, #tpu.memory_space<vmem>>, vector<1x1x8x8xbf16>
    %80 = vector.shape_cast %79 : vector<1x1x8x8xbf16> to vector<8x8xbf16>
    %81 = vector.shape_cast %78 : vector<8x8xbf16> to vector<1x1x8x8xbf16>
    tpu.vector_store %arg6[%c0_50, %c3_51, %c0_52, %c0_53], %81 {strides = array<i32>} : memref<1x4x8x8xbf16, #tpu.memory_space<vmem>>, vector<1x1x8x8xbf16>,
    %82 = vector.extract_strided_slice %18 {offsets = [0, 88], sizes = [8, 8], strides = [1, 1]} : vector<8x96xf32> to vector<8x8xf32>
    %83 = arith.truncf %82 : vector<8x8xf32> to vector<8x8xbf16>
    %c0_54 = arith.constant 0 : index
    %c3_55 = arith.constant 3 : index
    %c0_56 = arith.constant 0 : index
    %c0_57 = arith.constant 0 : index
    %84 = vector.load %arg7[%c0_54, %c3_55, %c0_56, %c0_57] : memref<1x4x8x8xbf16, #tpu.memory_space<vmem>>, vector<1x1x8x8xbf16>
    %85 = vector.shape_cast %84 : vector<1x1x8x8xbf16> to vector<8x8xbf16>
    %86 = vector.shape_cast %83 : vector<8x8xbf16> to vector<1x1x8x8xbf16>
    tpu.vector_store %arg7[%c0_54, %c3_55, %c0_56, %c0_57], %86 {strides = array<i32>} : memref<1x4x8x8xbf16, #tpu.memory_space<vmem>>, vector<1x1x8x8xbf16>,
    return
  }
  func.func @transform_0(%arg0: i32, %arg1: i32) -> (i32, i32, i32) {
    %c0_i32 = arith.constant 0 : i32
    %c0_i32_0 = arith.constant 0 : i32
    return %arg0, %arg1, %c0_i32 : i32, i32, i32
  }
  func.func @transform_1(%arg0: i32, %arg1: i32) -> (i32, i32) {
    %c0_i32 = arith.constant 0 : i32
    %c0_i32_0 = arith.constant 0 : i32
    %c0_i32_1 = arith.constant 0 : i32
    return %c0_i32, %c0_i32_0 : i32, i32
  }
  func.func @transform_2(%arg0: i32, %arg1: i32) -> (i32, i32) {
    %c0_i32 = arith.constant 0 : i32
    %c0_i32_0 = arith.constant 0 : i32
    %c0_i32_1 = arith.constant 0 : i32
    return %c0_i32, %c0_i32_0 : i32, i32
  }
  func.func @transform_3(%arg0: i32, %arg1: i32) -> (i32, i32, i32, i32) {
    %c0_i32 = arith.constant 0 : i32
    %c0_i32_0 = arith.constant 0 : i32
    %c0_i32_1 = arith.constant 0 : i32
    return %arg0, %c0_i32, %arg1, %c0_i32_0 : i32, i32, i32, i32
  }
  func.func @transform_4(%arg0: i32, %arg1: i32) -> (i32, i32, i32, i32) {
    %c0_i32 = arith.constant 0 : i32
    %c0_i32_0 = arith.constant 0 : i32
    %c0_i32_1 = arith.constant 0 : i32
    return %arg0, %c0_i32, %arg1, %c0_i32_0 : i32, i32, i32, i32
  }
  func.func @transform_5(%arg0: i32, %arg1: i32) -> (i32, i32, i32, i32) {
    %c0_i32 = arith.constant 0 : i32
    %c0_i32_0 = arith.constant 0 : i32
    %c0_i32_1 = arith.constant 0 : i32
    return %arg0, %c0_i32, %arg1, %c0_i32_0 : i32, i32, i32, i32
  }
}

module attributes {stable_mosaic.version = 11 : i64} {
  func.func @head_logits_lse_kernel(%arg0: i32, %arg1: i32, %arg2: i32, %arg3: memref<1x8x32xbf16, #tpu.memory_space<vmem>>, %arg4: memref<32x64xbf16, #tpu.memory_space<vmem>>, %arg5: memref<1x64xf32, #tpu.memory_space<vmem>>, %arg6: memref<1x8x64xf32, #tpu.memory_space<vmem>>, %arg7: memref<1x8x1xf32, #tpu.memory_space<vmem>>, %arg8: memref<8x1xf32, #tpu.memory_space<vmem>>, %arg9: memref<8x1xf32, #tpu.memory_space<vmem>>) attributes {dimension_semantics = [#tpu.dimension_semantics<parallel>, #tpu.dimension_semantics<parallel>, #tpu.dimension_semantics<arbitrary>], iteration_bounds = array<i64: 2, 1, 1>, scalar_prefetch = 0 : i64, scratch_operands = 2 : i64, tpu.core_type = #tpu.core_type<tc>, window_params = [{transform_indices = @transform_0, window_bounds = array<i64: 1, 8, 32>}, {transform_indices = @transform_1, window_bounds = array<i64: 32, 64>}, {transform_indices = @transform_2, window_bounds = array<i64: 1, 64>}, {transform_indices = @transform_3, window_bounds = array<i64: 1, 8, 64>}, {transform_indices = @transform_4, window_bounds = array<i64: 1, 8, 1>}]} {
    %c0_i32 = arith.constant 0 : i32
    %0 = arith.cmpi eq, %arg2, %c0_i32 : i32
    %1 = arith.extui %0 : i1 to i32
    %c0_i32_0 = arith.constant 0 : i32
    %2 = arith.cmpi ne, %1, %c0_i32_0 : i32
    scf.if %2 {
      %cst_22 = arith.constant 0xFF800000 : f32
      %32 = vector.broadcast %cst_22 : f32 to vector<8x1xf32>
      %c0_23 = arith.constant 0 : index
      %c0_24 = arith.constant 0 : index
      %33 = vector.load %arg8[%c0_23, %c0_24] : memref<8x1xf32, #tpu.memory_space<vmem>>, vector<8x1xf32>
      tpu.vector_store %arg8[%c0_23, %c0_24], %32 {strides = array<i32>} : memref<8x1xf32, #tpu.memory_space<vmem>>, vector<8x1xf32>,
      %cst_25 = arith.constant 0.000000e+00 : f32
      %34 = vector.broadcast %cst_25 : f32 to vector<8x1xf32>
      %c0_26 = arith.constant 0 : index
      %c0_27 = arith.constant 0 : index
      %35 = vector.load %arg9[%c0_26, %c0_27] : memref<8x1xf32, #tpu.memory_space<vmem>>, vector<8x1xf32>
      tpu.vector_store %arg9[%c0_26, %c0_27], %34 {strides = array<i32>} : memref<8x1xf32, #tpu.memory_space<vmem>>, vector<8x1xf32>,
    } else {
    }
    %c0 = arith.constant 0 : index
    %c0_1 = arith.constant 0 : index
    %c0_2 = arith.constant 0 : index
    %3 = vector.load %arg3[%c0, %c0_1, %c0_2] : memref<1x8x32xbf16, #tpu.memory_space<vmem>>, vector<1x8x32xbf16>
    %4 = vector.shape_cast %3 : vector<1x8x32xbf16> to vector<8x32xbf16>
    %c0_3 = arith.constant 0 : index
    %c0_4 = arith.constant 0 : index
    %5 = vector.load %arg4[%c0_3, %c0_4] : memref<32x64xbf16, #tpu.memory_space<vmem>>, vector<32x64xbf16>
    %cst = arith.constant dense<0.000000e+00> : vector<8x64xf32>
    %6 = tpu.matmul %4, %5, %cst {dimension_numbers = #tpu.dot_dimension_numbers<[1], [0], [0], [1], [0, 0, 1, 1], [], []>} : vector<8x32xbf16>, vector<32x64xbf16>, vector<8x64xf32> -> vector<8x64xf32>
    %c0_5 = arith.constant 0 : index
    %c0_6 = arith.constant 0 : index
    %7 = vector.load %arg5[%c0_5, %c0_6] : memref<1x64xf32, #tpu.memory_space<vmem>>, vector<1x64xf32>
    %8 = vector.broadcast %7 : vector<1x64xf32> to vector<8x64xf32>
    %9 = arith.addf %6, %8 : vector<8x64xf32>
    %c0_7 = arith.constant 0 : index
    %c0_8 = arith.constant 0 : index
    %c0_9 = arith.constant 0 : index
    %10 = vector.load %arg6[%c0_7, %c0_8, %c0_9] : memref<1x8x64xf32, #tpu.memory_space<vmem>>, vector<1x8x64xf32>
    %11 = vector.shape_cast %10 : vector<1x8x64xf32> to vector<8x64xf32>
    %12 = vector.shape_cast %9 : vector<8x64xf32> to vector<1x8x64xf32>
    tpu.vector_store %arg6[%c0_7, %c0_8, %c0_9], %12 {strides = array<i32>} : memref<1x8x64xf32, #tpu.memory_space<vmem>>, vector<1x8x64xf32>,
    %c0_10 = arith.constant 0 : index
    %c0_11 = arith.constant 0 : index
    %13 = vector.load %arg8[%c0_10, %c0_11] : memref<8x1xf32, #tpu.memory_space<vmem>>, vector<8x1xf32>
    %cst_12 = arith.constant dense<0xFF800000> : vector<8xf32>
    %14 = vector.multi_reduction <maximumf>, %9, %cst_12 [1] : vector<8x64xf32> to vector<8xf32>
    %15 = vector.shape_cast %14 : vector<8xf32> to vector<8x1xf32>
    %16 = arith.maximumf %13, %15 : vector<8x1xf32>
    %c0_13 = arith.constant 0 : index
    %c0_14 = arith.constant 0 : index
    %17 = vector.load %arg9[%c0_13, %c0_14] : memref<8x1xf32, #tpu.memory_space<vmem>>, vector<8x1xf32>
    %18 = arith.subf %13, %16 : vector<8x1xf32>
    %19 = math.exp %18 : vector<8x1xf32>
    %20 = arith.mulf %17, %19 : vector<8x1xf32>
    %21 = vector.broadcast %16 : vector<8x1xf32> to vector<8x64xf32>
    %22 = arith.subf %9, %21 : vector<8x64xf32>
    %23 = math.exp %22 : vector<8x64xf32>
    %cst_15 = arith.constant dense<0.000000e+00> : vector<8xf32>
    %24 = vector.multi_reduction <add>, %23, %cst_15 [1] : vector<8x64xf32> to vector<8xf32>
    %25 = vector.shape_cast %24 : vector<8xf32> to vector<8x1xf32>
    %26 = arith.addf %20, %25 : vector<8x1xf32>
    %c0_16 = arith.constant 0 : index
    %c0_17 = arith.constant 0 : index
    %27 = vector.load %arg9[%c0_16, %c0_17] : memref<8x1xf32, #tpu.memory_space<vmem>>, vector<8x1xf32>
    tpu.vector_store %arg9[%c0_16, %c0_17], %26 {strides = array<i32>} : memref<8x1xf32, #tpu.memory_space<vmem>>, vector<8x1xf32>,
    %c0_18 = arith.constant 0 : index
    %c0_19 = arith.constant 0 : index
    %28 = vector.load %arg8[%c0_18, %c0_19] : memref<8x1xf32, #tpu.memory_space<vmem>>, vector<8x1xf32>
    tpu.vector_store %arg8[%c0_18, %c0_19], %16 {strides = array<i32>} : memref<8x1xf32, #tpu.memory_space<vmem>>, vector<8x1xf32>,
    %c0_i32_20 = arith.constant 0 : i32
    %29 = arith.cmpi eq, %arg2, %c0_i32_20 : i32
    %30 = arith.extui %29 : i1 to i32
    %c0_i32_21 = arith.constant 0 : i32
    %31 = arith.cmpi ne, %30, %c0_i32_21 : i32
    scf.if %31 {
      %c0_22 = arith.constant 0 : index
      %c0_23 = arith.constant 0 : index
      %32 = vector.load %arg8[%c0_22, %c0_23] : memref<8x1xf32, #tpu.memory_space<vmem>>, vector<8x1xf32>
      %c0_24 = arith.constant 0 : index
      %c0_25 = arith.constant 0 : index
      %33 = vector.load %arg9[%c0_24, %c0_25] : memref<8x1xf32, #tpu.memory_space<vmem>>, vector<8x1xf32>
      %34 = math.log %33 : vector<8x1xf32>
      %35 = arith.addf %32, %34 : vector<8x1xf32>
      %c0_26 = arith.constant 0 : index
      %c0_27 = arith.constant 0 : index
      %c0_28 = arith.constant 0 : index
      %36 = vector.load %arg7[%c0_26, %c0_27, %c0_28] : memref<1x8x1xf32, #tpu.memory_space<vmem>>, vector<1x8x1xf32>
      %37 = vector.shape_cast %36 : vector<1x8x1xf32> to vector<8x1xf32>
      %38 = vector.shape_cast %35 : vector<8x1xf32> to vector<1x8x1xf32>
      tpu.vector_store %arg7[%c0_26, %c0_27, %c0_28], %38 {strides = array<i32>} : memref<1x8x1xf32, #tpu.memory_space<vmem>>, vector<1x8x1xf32>,
    } else {
    }
    return
  }
  func.func @transform_0(%arg0: i32, %arg1: i32, %arg2: i32) -> (i32, i32, i32) {
    %c0_i32 = arith.constant 0 : i32
    %c0_i32_0 = arith.constant 0 : i32
    return %arg0, %arg1, %c0_i32 : i32, i32, i32
  }
  func.func @transform_1(%arg0: i32, %arg1: i32, %arg2: i32) -> (i32, i32) {
    %c0_i32 = arith.constant 0 : i32
    %c0_i32_0 = arith.constant 0 : i32
    return %c0_i32, %arg2 : i32, i32
  }
  func.func @transform_2(%arg0: i32, %arg1: i32, %arg2: i32) -> (i32, i32) {
    %c0_i32 = arith.constant 0 : i32
    %c0_i32_0 = arith.constant 0 : i32
    return %c0_i32, %arg2 : i32, i32
  }
  func.func @transform_3(%arg0: i32, %arg1: i32, %arg2: i32) -> (i32, i32, i32) {
    %c0_i32 = arith.constant 0 : i32
    return %arg0, %arg1, %arg2 : i32, i32, i32
  }
  func.func @transform_4(%arg0: i32, %arg1: i32, %arg2: i32) -> (i32, i32, i32) {
    %c0_i32 = arith.constant 0 : i32
    %c0_i32_0 = arith.constant 0 : i32
    return %arg0, %arg1, %c0_i32 : i32, i32, i32
  }
}

module attributes {stable_mosaic.version = 11 : i64} {
  func.func @log_softmax_finalize_kernel(%arg0: i32, %arg1: i32, %arg2: i32, %arg3: memref<1x8x64xf32, #tpu.memory_space<vmem>>, %arg4: memref<1x8x1xf32, #tpu.memory_space<vmem>>, %arg5: memref<1x8x64xf32, #tpu.memory_space<vmem>>) attributes {dimension_semantics = [#tpu.dimension_semantics<parallel>, #tpu.dimension_semantics<parallel>, #tpu.dimension_semantics<parallel>], iteration_bounds = array<i64: 2, 1, 1>, scalar_prefetch = 0 : i64, scratch_operands = 0 : i64, tpu.core_type = #tpu.core_type<tc>, window_params = [{transform_indices = @transform_0, window_bounds = array<i64: 1, 8, 64>}, {transform_indices = @transform_1, window_bounds = array<i64: 1, 8, 1>}, {transform_indices = @transform_2, window_bounds = array<i64: 1, 8, 64>}]} {
    %c0 = arith.constant 0 : index
    %c0_0 = arith.constant 0 : index
    %c0_1 = arith.constant 0 : index
    %0 = vector.load %arg3[%c0, %c0_0, %c0_1] : memref<1x8x64xf32, #tpu.memory_space<vmem>>, vector<1x8x64xf32>
    %1 = vector.shape_cast %0 : vector<1x8x64xf32> to vector<8x64xf32>
    %c0_2 = arith.constant 0 : index
    %c0_3 = arith.constant 0 : index
    %c0_4 = arith.constant 0 : index
    %2 = vector.load %arg4[%c0_2, %c0_3, %c0_4] : memref<1x8x1xf32, #tpu.memory_space<vmem>>, vector<1x8x1xf32>
    %3 = vector.shape_cast %2 : vector<1x8x1xf32> to vector<8x1xf32>
    %4 = vector.broadcast %3 : vector<8x1xf32> to vector<8x64xf32>
    %5 = arith.subf %1, %4 : vector<8x64xf32>
    %c0_5 = arith.constant 0 : index
    %c0_6 = arith.constant 0 : index
    %c0_7 = arith.constant 0 : index
    %6 = vector.load %arg5[%c0_5, %c0_6, %c0_7] : memref<1x8x64xf32, #tpu.memory_space<vmem>>, vector<1x8x64xf32>
    %7 = vector.shape_cast %6 : vector<1x8x64xf32> to vector<8x64xf32>
    %8 = vector.shape_cast %5 : vector<8x64xf32> to vector<1x8x64xf32>
    tpu.vector_store %arg5[%c0_5, %c0_6, %c0_7], %8 {strides = array<i32>} : memref<1x8x64xf32, #tpu.memory_space<vmem>>, vector<1x8x64xf32>,
    return
  }
  func.func @transform_0(%arg0: i32, %arg1: i32, %arg2: i32) -> (i32, i32, i32) {
    %c0_i32 = arith.constant 0 : i32
    return %arg0, %arg1, %arg2 : i32, i32, i32
  }
  func.func @transform_1(%arg0: i32, %arg1: i32, %arg2: i32) -> (i32, i32, i32) {
    %c0_i32 = arith.constant 0 : i32
    %c0_i32_0 = arith.constant 0 : i32
    return %arg0, %arg1, %c0_i32 : i32, i32, i32
  }
  func.func @transform_2(%arg0: i32, %arg1: i32, %arg2: i32) -> (i32, i32, i32) {
    %c0_i32 = arith.constant 0 : i32
    return %arg0, %arg1, %arg2 : i32, i32, i32
  }
}

</mosaic_0001>

<bundles_post_ra>
// kernel: transformer_forward.9
= control target key start
LH: loop header
LB: loop body
LE: loop exit
PB: predicated region body
PF: predicated region fallthrough
CT: control target
= control target key end

     0   :  { %s772_s12 = smov 0   ;;  %s774_s13 = smov 0   ;;  %s846_s0 = inlined_call_operand.vmem [shape: bf16[2,4,8,8], index: 0, kind: input, shape index: {}]   ;;  %s847_s1 = inlined_call_operand.vmem [shape: bf16[2,4,8,8], index: 1, kind: input, shape index: {}]   ;;  %s848_s2 = inlined_call_operand.vmem [shape: bf16[2,4,8,8], index: 2, kind: input, shape index: {}]   ;;  %s849_s3 = inlined_call_operand.vmem [shape: bf16[2,4,8,8], index: 3, kind: output, shape index: {}]  }
   0x1   :  { %s776_s14 = smov 0   ;;  %s778_s15 = smov 0  }
   0x2   :  { %s780_s16 = smov 0  }
   0x3 LB: > { %s35_s17 = sadd.s32 1, %s738_s14  ;;  %s39_s18 = sadd.s32 1, %s742_s15  ;;  %s746_s16 = sphi %s780_s16, %s13_s16   ;;  %s742_s15 = sphi %s778_s15, %s853_s15   ;;  %s738_s14 = sphi %s776_s14, %s852_s14   ;;  %s734_s13 = sphi %s774_s13, %s851_s13   ;;  %s730_s12 = sphi %s772_s12, %s850_s12  }
   0x4   : > { %p37_p0 = scmp.ge.s32.totalorder %s35_s17, 4  ;;  %p627_p1 = scmp.ge.s32.totalorder %s746_s16, 1 }
   0x5   : > { %p217_p2 = scmp.lt.s32.totalorder %s746_s16, 9 }
   0x6   : > { %s855_s17 = smov (%p37_p0, %s35_s17), 0  ;;  %s857_s18 = smov (!%p37_p0, %s39_s18), %s742_s15 }
   0x7   : > { %p218_p3 = pnand %p627_p1, %p217_p2  ;;  %p41_p4 = scmp.ge.s32.totalorder %s857_s18, 2 }
   0x8   : > { %p275_p5 = scmp.lt.s32.totalorder (!%p218_p3), %s734_s13, 1  ;;  %p277_p6 = scmp.lt.s32.totalorder (!%p218_p3), %s730_s12, 3  ;;  %vm327_vm0 = vcmask (!%p218_p3), 64512   ;;  %v748_v0 = vmov (!%p218_p3), 0.0   ;;  %vm749_vm1 = vmmov (!%p218_p3), 0   ;;  %vm324_vm2 = vcmask (!%p218_p3), 7168  }
   0x9   : > { %s859_s18 = smov (%p41_p4, %s857_s18), 0  ;;  %221 = sbr.rel (%p218_p3) target bundleno = 827 (0x33b), region = 32 }
   0xa   : > { %644 = vmatprep.subr.bf16.mxu0 (!%p218_p3), %v748_v0  ;;  %328 = vst.msk [vmem:[#allocation4] sm:$0xff] (!%p218_p3), %vm327_vm0, %v748_v0  ;;  %646 = vmatprep.mubr.msk.bf16.mxu0 (!%p218_p3), %vm749_vm1, %v748_v0  ;;  %v750_v4 = vmov (!%p218_p3), -inf   ;;  %v751_v10 = vmov (!%p218_p3), 0   ;;  %vm414_vm3 = vcmask (!%p218_p3), 1043456   ;;  %vm474_vm4 = vcmask (!%p218_p3), 60416  }
   0xb   : > { %650 = vmatprep.subr.bf16.mxu1 (!%p218_p3), %v748_v0  ;;  %652 = vmatprep.mubr.msk.bf16.mxu1 (!%p218_p3), %vm749_vm1, %v748_v0  ;;  %325 = vst.msk [vmem:[#allocation2] sm:$0xff] (!%p218_p3), %vm324_vm2, %v750_v4  ;;  %326 = vst.msk [vmem:[#allocation3] sm:$0xff] (!%p218_p3), %vm324_vm2, %v748_v0 }
   0xc   : > { %700 = vset.pattern.permute.xlu0 (!%p218_p3), %v751_v10  ;;  %701 = vset.pattern.permute.xlu1 (!%p218_p3), %v751_v10 }
  0x10   : > { %s861_s13 = smov (!%p275_p5, %s734_s13), 1  ;;  %s863_s12 = smov (!%p277_p6, %s730_s12), 3 }
  0x11   : > { %s628_s19 = sshll.u32 %s861_s13, 2  ;;  %v403_v31 = vld [vmem:[#allocation4] sm:$0xff] }
  0x12   : > { %s283_s20 = sadd.s32 %s628_s19, %s863_s12  ;;  %v379_v11 = vld [vmem:[#allocation2] sm:$0xff]  ;;  %v395_v25 = vld [vmem:[#allocation3] sm:$0xff] }
  0x13   : > { %s803_s21 = sshll.u32 %s283_s20, 2 }
  0x14   : > { %s296_s24 = scalar_lea.vmem %s847_s1, %s803_s21  ;;  %s285_s27 = scalar_lea.vmem %s846_s0, %s803_s21 }
  0x15   : > { %v330_v1 = vld [vmem:[%s296_s24] sm:$0xf]  ;;  %s307_s30 = scalar_lea.vmem %s848_s2, %s803_s21  ;;  %s318_s6 = scalar_lea.vmem %s849_s3, %s803_s21 }
  0x16   : > { %v337_v2 = vsel %vm327_vm0, %v330_v1, 0  ;;  %v329_v3 = vld [vmem:[%s285_s27] sm:$0xf] }
  0x17   : > { %645 = vmatpush3.bf16.xpose.msra.mxu0 %v337_v2  ;;  %v331_v15 = vld [vmem:[%s307_s30] sm:$0xf] }
  0x18   : > { %v416_v16 = vsel %vm414_vm3, %v331_v15, 0 }
  0x19   : > { %651 = vmatpush3.bf16.msra.mxu1 %v416_v16 }
  0x1e   : > { %647 = vmatmul.mubr.msk.bf16.vlgmr.msra.gmra.mrb[0].mxu0 %vm327_vm0, %v329_v3 }
  0xf1   : > { %v373_v5 = vpop.f32.mrb[0].mxu0 }
  0xf2   : > { %v648_v6 = vpop.f32.mrb[1].mxu0  ;;  %v380_v7 = vsel %vm327_vm0, %v373_v5, -inf }
  0xf3   : > { %381 = vmax.xlane.f32.xlu0 %v380_v7  ;;  %v376_v8 = vpop.f32.mrb[2].mxu0 }
  0xf4   : > { %v649_v9 = vpop.f32.mrb[3].mxu0 }
 0x180   : > { %v382_v12 = vpop.xlane.xlu0 %381 }
 0x181   : > { %v383_v13 = vmax.f32 %v379_v11, %v382_v12 }
 0x183   : > { %v384_v14 = vsub.f32 %v379_v11, %v383_v13  ;;  %460 = vst.msk [vmem:[#allocation2] sm:$0xff] %vm324_vm2, %v383_v13  ;;  %389 = vperm.xlu0 %700, %v383_v13  }
 0x185   : > { %v385_v23 = vmul.f32 1.442695, %v384_v14 }
 0x202   : > { %v390_v17 = vpop.permute.xlu0 %389 }
 0x203   : > { %v392_v18 = vsub.f32 %v373_v5, %v390_v17 }
 0x205   : > { %v393_v19 = vmul.f32 1.442695, %v392_v18 }
 0x207   : > { %702 = vpow2.f32 %v393_v19 }
 0x208   : > { %704 = vpow2.f32 %v385_v23 }
 0x211   : > { %v703_v20 = vpop.eup %702 }
 0x212   : > { %v397_v21 = vsel %vm327_vm0, %v703_v20, 0.0  ;;  %v410_v22 = vpack.c.bf16 %v703_v20, %v703_v20  ;;  %v705_v24 = vpop.eup %704 }
 0x213   : > { %398 = vadd.xlane.f32.xlu1 %v397_v21  ;;  %v396_v26 = vmul.f32 %v705_v24, %v395_v25 }
 0x214   : > { %653 = vmatmul.mubr.msk.bf16.vlgmr.msra.gmra.mrb[0].mxu1 %vm327_vm0, %v410_v22 }
 0x224   : > { %406 = vperm.xlu1 %701, %v705_v24  }
 0x2a0   : > { %v399_v27 = vpop.xlane.xlu1 %398 }
 0x2a1   : > { %v400_v28 = vadd.f32 %v399_v27, %v396_v26 }
 0x2a3   : > { %402 = vst.msk [vmem:[#allocation3] sm:$0xff] %vm324_vm2, %v400_v28 }
 0x2a4   : > { %v407_v32 = vpop.permute.xlu1 %406 }
 0x2a5   : > { %v409_v33 = vmul.f32 %v407_v32, %v403_v31 }
 0x2aa   : > { %v465_v29 = vld [vmem:[#allocation3] sm:$0xff] }
 0x2ab   : > { %706 = vrcp.f32 %v465_v29 }
 0x2b5   : > { %v707_v30 = vpop.eup %706 }
 0x2b6   : > { %469 = vperm.xlu1 %701, %v707_v30  }
 0x2e7   : > { %v452_v34 = vpop.f32.mrb[0].mxu1 }
 0x2e8   : > { %v458_v35 = vadd.f32 %v452_v34, %v409_v33  ;;  %v654_v36 = vpop.f32.mrb[1].mxu1 }
 0x2e9   : > { %v455_v37 = vpop.f32.mrb[2].mxu1 }
 0x2ea   : > { %459 = vst.msk [vmem:[#allocation4] sm:$0xff] %vm327_vm0, %v458_v35  ;;  %v655_v38 = vpop.f32.mrb[3].mxu1 }
 0x2f1   : > { %v464_v39 = vld [vmem:[#allocation4] sm:$0xff] }
 0x335   : > { %v470_v40 = vpop.permute.xlu1 %469 }
 0x336   : > { %v472_v41 = vmul.f32 %v470_v40, %v464_v39 }
 0x338   : > { %v473_v42 = vpack.c.bf16 %v472_v41, %v472_v41 }
 0x33a   : > { %475 = vst.msk [vmem:[%s318_s6] sm:$0xf] %vm474_vm4, %v473_v42 }
 0x33b PF: > { %s13_s16 = sadd.s32 1, %s746_s16   ;;  %s850_s12 = smov %s738_s14 }
 0x33c   : > { %p10_p7 = scmp.ge.s32.totalorder %s13_s16, 10   ;;  %s851_s13 = smov %s742_s15 }
 0x33d   : > { %s852_s14 = smov %s855_s17  ;;  %s853_s15 = smov %s859_s18 }
 0x33e   :  { %12 = sbr.rel (!%p10_p7) target bundleno = 3 (0x3), region = 76 }

// kernel: transformer_forward.8
= control target key start
LH: loop header
LB: loop body
LE: loop exit
PB: predicated region body
PF: predicated region fallthrough
CT: control target
= control target key end

     0   :  { %s1010_s27 = smov 0   ;;  %s1012_s28 = smov 0   ;;  %s1098_s0 = inlined_call_operand.vmem [shape: bf16[2,8,32], index: 0, kind: input, shape index: {}]   ;;  %s1099_s1 = inlined_call_operand.vmem [shape: bf16[8,32], index: 1, kind: input, shape index: {}]   ;;  %s1100_s2 = inlined_call_operand.vmem [shape: bf16[8,32], index: 2, kind: input, shape index: {}]   ;;  %s1101_s3 = inlined_call_operand.vmem [shape: f32[1,32], index: 3, kind: input, shape index: {}]   ;;  %s1102_s4 = inlined_call_operand.vmem [shape: bf16[32,96], index: 4, kind: input, shape index: {}]   ;;  %s1103_s5 = inlined_call_operand.vmem [shape: bf16[2,8,32], index: 5, kind: output, shape index: {0}]   ;;  %s1104_s6 = inlined_call_operand.vmem [shape: bf16[2,4,8,8], index: 6, kind: output, shape index: {1}]   ;;  %s1105_s7 = inlined_call_operand.vmem [shape: bf16[2,4,8,8], index: 7, kind: output, shape index: {2}]   ;;  %s1106_s8 = inlined_call_operand.vmem [shape: bf16[2,4,8,8], index: 8, kind: output, shape index: {3}]  }
   0x1   :  { %s1014_s29 = smov 0  }
   0x2 LB: > { %s31_s30 = sadd.s32 1, %s945_s28  ;;  %p843_p0 = scmp.ge.s32.totalorder %s949_s29, 1  ;;  %s949_s29 = sphi %s1014_s29, %s19_s29   ;;  %s945_s28 = sphi %s1012_s28, %s1108_s28   ;;  %s941_s27 = sphi %s1010_s27, %s1107_s27  }
   0x3   : > { %p33_p1 = scmp.ge.s32.totalorder %s31_s30, 2  ;;  %p311_p2 = scmp.lt.s32.totalorder %s949_s29, 3 }
   0x5   : > { %s1110_s30 = smov (%p33_p1, %s31_s30), 0  ;;  %p312_p3 = pnand %p843_p0, %p311_p2 }
   0x6   : > { %p381_p4 = scmp.lt.s32.totalorder (!%p312_p3), %s941_s27, 1  ;;  %s951_s13 = smov (!%p312_p3), 112   ;;  %v439_v2 = vld [vmem:[%s1099_s1] sm:$0xf] (!%p312_p3)  ;;  %vm437_vm0 = vcmask (!%p312_p3), 130048   ;;  %vm447_vm1 = vcmask (!%p312_p3), 257024  }
   0x7   : > { %315 = sbr.rel (%p312_p3) target bundleno = 664 (0x298), region = 40  ;;  %s952_s14 = smov (!%p312_p3), 16   ;;  %v442_v3 = vld [vmem:[%s1100_s2] sm:$0xf] (!%p312_p3)  ;;  %v440_v5 = vunpack.c.l.bf16 (!%p312_p3), %v439_v2  ;;  %vm451_vm2 = vcmask (!%p312_p3), 261120   ;;  %v953_v16 = vmov (!%p312_p3), 0.0  }
   0x8   : > { %v443_v6 = vunpack.c.l.bf16 (!%p312_p3), %v442_v3  ;;  %v923_v15 = vld [vmem:[%s1102_s4] sm:$0xff] (!%p312_p3)   ;;  %877 = vmatprep.subr.bf16.mxu0 (!%p312_p3), %v953_v16  ;;  %vm954_vm3 = vmmov (!%p312_p3), 0   ;;  %v924_v17 = vld [vmem:[%s1102_s4 + $0x8] sm:$0xff] (!%p312_p3)   ;;  %vm529_vm4 = vcmask (!%p312_p3), 60416   ;;  %s955_s15 = smov (!%p312_p3), 64   ;;  %s956_s16 = smov (!%p312_p3), 96  }
   0x9   : > { %881 = vmatprep.mubr.msk.bf16.mxu0 (!%p312_p3), %vm954_vm3, %v953_v16  ;;  %878 = vmatpush3.bf16.msra.mxu0 (!%p312_p3), %v923_v15  ;;  %v852_v22 = vld [vmem:[%s1101_s3] ss:$0 sm:$0xff] (!%p312_p3)  ;;  %s958_s17 = smov (!%p312_p3), 48   ;;  %s959_s18 = smov (!%p312_p3), 56  }
   0xa   : > { %879 = vmatprep.subr.bf16.mxu0 (!%p312_p3), %v953_v16  ;;  %s960_s19 = smov (!%p312_p3), 80   ;;  %s961_s20 = smov (!%p312_p3), 72  }
   0xb   : > { %s963_s22 = smov (!%p312_p3), 104   ;;  %s964_s23 = smov (!%p312_p3), 40  }
   0xd   : > { %880 = vmatpush3.bf16.msra.mxu0 (!%p312_p3), %v924_v17 }
   0xe   : > { %s1112_s27 = smov (!%p381_p4, %s941_s27), 1 }
   0xf   : > { %s844_s9 = sshll.u32 %s1112_s27, 2  ;;  %s1056_s10 = sshll.u32 %s1112_s27, 4 }
  0x10   : > { %s387_s12 = scalar_lea.vmem %s1098_s0, %s844_s9  ;;  %s402_s21 = scalar_lea.vmem %s1103_s5, %s844_s9 }
  0x11   : > { %v428_v0 = vld [vmem:[%s387_s12] sm:$0xf]  ;;  %s957_s27 = smov 88   ;;  %s426_s26 = scalar_lea.vmem %s1106_s8, %s1056_s10 }
  0x12   : > { %v429_v1 = vunpack.c.l.bf16 %v428_v0  ;;  %s418_s12 = scalar_lea.vmem %s1105_s7, %s1056_s10 }
  0x14   : > { %431 = vrot.lane.b32.xlu0 %v429_v1, %s951_s13  ;;  %v441_v8 = vmul.f32 %v440_v5, %v429_v1 }
  0x18   : > { %434 = vrot.lane.b32.xlu0 %v429_v1, %s952_s14  ;;  %s1062_s14 = scalar_lea.vmem %s1104_s6, %s1056_s10 }
  0x86   : > { %v432_v4 = vpop.permute.xlu0 %431 }
  0x8a   : > { %v435_v7 = vpop.permute.xlu0 %434 }
  0x8b   : > { %v438_v9 = vsel %vm437_vm0, %v432_v4, %v435_v7 }
  0x8c   : > { %v444_v10 = vmul.f32 %v443_v6, %v438_v9 }
  0x8e   : > { %v445_v11 = vadd.f32 %v444_v10, %v441_v8 }
  0x90   : > { %v446_v12 = vpack.c.bf16 %v445_v11, %v445_v11  ;;  %v450_v13 = vmul.f32 %v445_v11, %v445_v11 }
  0x92   : > { %448 = vst.msk [vmem:[%s402_s21] sm:$0xf] %vm447_vm1, %v446_v12  ;;  %v452_v14 = vsel %vm451_vm2, %v450_v13, 0.0  ;;  %s962_s21 = smov 120  }
  0x93   : > { %453 = vadd.xlane.f32.xlu1 %v452_v14 }
 0x120   : > { %v454_v18 = vpop.xlane.xlu1 %453 }
 0x121   : > { %v456_v19 = vmul.f32 0.03125, %v454_v18 }
 0x123   : > { %v457_v20 = vadd.f32 1e-06, %v456_v19 }
 0x125   : > { %925 = vrsqrt.f32 %v457_v20 }
 0x12f   : > { %v926_v21 = vpop.eup %925 }
 0x130   : > { %v459_v23 = vmul.f32 %v926_v21, %v445_v11 }
 0x132   : > { %v466_v24 = vmul.f32 %v852_v22, %v459_v23 }
 0x134   : > { %v467_v25 = vpack.c.bf16 %v466_v24, %v466_v24 }
 0x136   : > { %882 = vmatmul.mubr.msk.bf16.vlgmr.msra.gmra.mrb[0].mxu0 %vm451_vm2, %v467_v25 }
 0x209   : > { %v521_v26 = vpop.f32.mrb[0].mxu0 }
 0x20a   : > { %v527_v27 = vmul.f32 0.35355338, %v521_v26  ;;  %v872_v28 = vpack.c.bf16 %v521_v26, %v521_v26  ;;  %v883_v29 = vpop.f32.mrb[1].mxu0 }
 0x20b   : > { %v524_v30 = vpop.f32.mrb[2].mxu0 }
 0x20c   : > { %v528_v31 = vpack.c.bf16 %v527_v27, %v527_v27  ;;  %539 = vrot.lane.b32.xlu0 %v872_v28, %s955_s15  ;;  %535 = vrot.lane.b32.xlu1 %v872_v28, %s956_s16  ;;  %v884_v32 = vpop.f32.mrb[3].mxu0 }
 0x20e   : > { %530 = vst.msk [vmem:[%s1062_s14] sm:$0xf] %vm529_vm4, %v528_v31 }
 0x210   : > { %551 = vrot.lane.b32.xlu0 %v872_v28, %s957_s27  ;;  %571 = vrot.lane.b32.xlu1 %v872_v28, %s958_s17 }
 0x214   : > { %556 = vrot.lane.b32.xlu0 %v872_v28, %s959_s18  ;;  %561 = vrot.lane.b32.xlu1 %v528_v31, %s951_s13 }
 0x218   : > { %566 = vrot.lane.b32.xlu0 %v872_v28, %s960_s19  ;;  %581 = vrot.lane.b32.xlu1 %v872_v28, %s961_s20 }
 0x21c   : > { %546 = vrot.lane.b32.xlu0 %v528_v31, %s962_s21 }
 0x220   : > { %576 = vrot.lane.b32.xlu0 %v528_v31, %s963_s22 }
 0x224   : > { %586 = vrot.lane.b32.xlu0 %v872_v28, %s964_s23 }
 0x27e   : > { %v540_v33 = vpop.permute.xlu0 %539  ;;  %v536_v34 = vpop.permute.xlu1 %535 }
 0x27f   : > { %542 = vst.msk [vmem:[%s426_s26] sm:$0xf] %vm529_vm4, %v540_v33  ;;  %538 = vst.msk [vmem:[%s418_s12] sm:$0xf] %vm529_vm4, %v536_v34 }
 0x282   : > { %v552_v35 = vpop.permute.xlu0 %551  ;;  %v572_v36 = vpop.permute.xlu1 %571 }
 0x283   : > { %859 = vst.msk [vmem:[%s418_s12 + $0x4] sm:$0xf] %vm529_vm4, %v552_v35  ;;  %863 = vst.msk [vmem:[%s426_s26 + $0x8] sm:$0xf] %vm529_vm4, %v572_v36 }
 0x286   : > { %v557_v37 = vpop.permute.xlu0 %556  ;;  %v562_v38 = vpop.permute.xlu1 %561 }
 0x287   : > { %860 = vst.msk [vmem:[%s426_s26 + $0x4] sm:$0xf] %vm529_vm4, %v557_v37  ;;  %861 = vst.msk [vmem:[%s1062_s14 + $0x8] sm:$0xf] %vm529_vm4, %v562_v38 }
 0x28a   : > { %v567_v39 = vpop.permute.xlu0 %566  ;;  %v582_v40 = vpop.permute.xlu1 %581 }
 0x28b   : > { %862 = vst.msk [vmem:[%s418_s12 + $0x8] sm:$0xf] %vm529_vm4, %v567_v39  ;;  %865 = vst.msk [vmem:[%s418_s12 + $0xc] sm:$0xf] %vm529_vm4, %v582_v40 }
 0x28e   : > { %v547_v41 = vpop.permute.xlu0 %546 }
 0x28f   : > { %858 = vst.msk [vmem:[%s1062_s14 + $0x4] sm:$0xf] %vm529_vm4, %v547_v41 }
 0x292   : > { %v577_v42 = vpop.permute.xlu0 %576 }
 0x293   : > { %864 = vst.msk [vmem:[%s1062_s14 + $0xc] sm:$0xf] %vm529_vm4, %v577_v42 }
 0x296   : > { %v587_v43 = vpop.permute.xlu0 %586 }
 0x297   : > { %866 = vst.msk [vmem:[%s426_s26 + $0xc] sm:$0xf] %vm529_vm4, %v587_v43 }
 0x298 PF: > { %s19_s29 = sadd.s32 1, %s949_s29   ;;  %s1107_s27 = smov %s945_s28 }
 0x299   : > { %p16_p5 = scmp.ge.s32.totalorder %s19_s29, 4   ;;  %s1108_s28 = smov %s1110_s30 }
 0x29b   :  { %18 = sbr.rel (!%p16_p5) target bundleno = 2 (0x2), region = 121 }

// kernel: transformer_forward.10
= control target key start
LH: loop header
LB: loop body
LE: loop exit
PB: predicated region body
PF: predicated region fallthrough
CT: control target
= control target key end

     0   :  { %s912_s24 = smov 0   ;;  %s914_s25 = smov 0   ;;  %s1004_s0 = inlined_call_operand.vmem [shape: bf16[2,8,32], index: 0, kind: input, shape index: {}]   ;;  %s1005_s1 = inlined_call_operand.vmem [shape: bf16[2,4,8,8], index: 1, kind: input, shape index: {}]   ;;  %s1006_s2 = inlined_call_operand.vmem [shape: f32[1,32], index: 2, kind: input, shape index: {}]   ;;  %s1007_s3 = inlined_call_operand.vmem [shape: bf16[32,32], index: 3, kind: input, shape index: {}]   ;;  %s1008_s4 = inlined_call_operand.vmem [shape: bf16[32,32], index: 4, kind: input, shape index: {}]   ;;  %s1009_s5 = inlined_call_operand.vmem [shape: bf16[32,32], index: 5, kind: input, shape index: {}]   ;;  %s1010_s6 = inlined_call_operand.vmem [shape: bf16[32,32], index: 6, kind: input, shape index: {}]   ;;  %s1011_s7 = inlined_call_operand.vmem [shape: bf16[2,8,32], index: 7, kind: output, shape index: {}]  }
   0x1   :  { %s916_s26 = smov 0  }
   0x2 LB: > { %s29_s27 = sadd.s32 1, %s861_s25  ;;  %p730_p0 = scmp.ge.s32.totalorder %s865_s26, 1  ;;  %s865_s26 = sphi %s916_s26, %s17_s26   ;;  %s861_s25 = sphi %s914_s25, %s1013_s25   ;;  %s857_s24 = sphi %s912_s24, %s1012_s24  }
   0x3   : > { %p31_p1 = scmp.ge.s32.totalorder %s29_s27, 2  ;;  %p270_p2 = scmp.lt.s32.totalorder %s865_s26, 3 }
   0x5   : > { %s1015_s27 = smov (%p31_p1, %s29_s27), 0  ;;  %p271_p3 = pnand %p730_p0, %p270_p2 }
   0x6   : > { %p314_p4 = scmp.lt.s32.totalorder (!%p271_p3), %s857_s24, 1  ;;  %v833_v0 = vld [vmem:[%s1007_s3] sm:$0xff] (!%p271_p3)   ;;  %v867_v1 = vmov (!%p271_p3), 0.0   ;;  %v834_v2 = vld [vmem:[%s1007_s3 + $0x8] sm:$0xff] (!%p271_p3)   ;;  %vm868_vm0 = vmmov (!%p271_p3), 0   ;;  %s869_s13 = smov (!%p271_p3), 8  }
   0x7   : > { %274 = sbr.rel (%p271_p3) target bundleno = 1168 (0x490), region = 48  ;;  %769 = vmatprep.subr.bf16.mxu0 (!%p271_p3), %v867_v1  ;;  %777 = vmatprep.subr.bf16.mxu1 (!%p271_p3), %v867_v1  ;;  %s870_s14 = smov (!%p271_p3), 24   ;;  %vm361_vm1 = vcmask (!%p271_p3), 64512   ;;  %vm365_vm2 = vcmask (!%p271_p3), 130048   ;;  %vm368_vm3 = vcmask (!%p271_p3), 195584   ;;  %vm387_vm4 = vcmask (!%p271_p3), 261120  }
   0x8   : > { %770 = vmatpush3.bf16.msra.mxu0 (!%p271_p3), %v833_v0  ;;  %773 = vmatprep.mubr.msk.bf16.mxu0 (!%p271_p3), %vm868_vm0, %v867_v1  ;;  %s871_s15 = smov (!%p271_p3), 16   ;;  %v835_v22 = vld [vmem:[%s1008_s4] sm:$0xff] (!%p271_p3)   ;;  %v836_v23 = vld [vmem:[%s1008_s4 + $0x8] sm:$0xff] (!%p271_p3)   ;;  %vm632_vm5 = vcmask (!%p271_p3), 257024  }
   0x9   : > { %771 = vmatprep.subr.bf16.mxu0 (!%p271_p3), %v867_v1  ;;  %781 = vmatprep.mubr.msk.bf16.mxu1 (!%p271_p3), %vm868_vm0, %v867_v1  ;;  %v837_v24 = vld [vmem:[%s1009_s5] sm:$0xff] (!%p271_p3)   ;;  %v838_v33 = vld [vmem:[%s1009_s5 + $0x8] sm:$0xff] (!%p271_p3)  }
   0xa   : > { %778 = vmatpush3.bf16.msra.mxu1 (!%p271_p3), %v835_v22  ;;  %v744_v29 = vld [vmem:[%s1006_s2] ss:$0 sm:$0xff] (!%p271_p3)  ;;  %v840_v41 = vld [vmem:[%s1010_s6 + $0x8] sm:$0xff] (!%p271_p3)  }
   0xb   : > { %779 = vmatprep.subr.bf16.mxu1 (!%p271_p3), %v867_v1  ;;  %v839_v34 = vld [vmem:[%s1010_s6] sm:$0xff] (!%p271_p3)  }
   0xc   : > { %772 = vmatpush3.bf16.msra.mxu0 (!%p271_p3), %v834_v2 }
   0xd   : > { %785 = vmatprep.subr.bf16.mxu0 (!%p271_p3), %v867_v1 }
   0xe   : > { %s1017_s24 = smov (!%p314_p4, %s857_s24), 1  ;;  %780 = vmatpush3.bf16.msra.mxu1 %v836_v23 }
   0xf   : > { %s756_s9 = sshll.u32 %s1017_s24, 4  ;;  %s731_s16 = sshll.u32 %s1017_s24, 2  ;;  %793 = vmatprep.subr.bf16.mxu1 %v867_v1 }
  0x10   : > { %s328_s12 = scalar_lea.vmem %s1005_s1, %s756_s9  ;;  %s320_s19 = scalar_lea.vmem %s1004_s0, %s731_s16 }
  0x11   : > { %v830_v3 = vld [vmem:[%s328_s12 + $0x4] ss:$0 sps:$4 sm:$0xff]   ;;  %v832_v4 = vld [vmem:[%s328_s12 + $0xc] ss:$0 sps:$4 sm:$0xff]   ;;  %v831_v5 = vld [vmem:[%s328_s12 + $0x8] ss:$0 sps:$4 sm:$0xff]   ;;  %s335_s18 = scalar_lea.vmem %s1011_s7, %s731_s16 }
  0x12   : > { %349 = vrot.lane.b32.xlu0 %v830_v3, %s869_s13  ;;  %359 = vrot.lane.b32.xlu1 %v832_v4, %s870_s14  ;;  %v339_v7 = vld [vmem:[%s328_s12] sm:$0xf] }
  0x13   : > { %v337_v13 = vld [vmem:[%s320_s19] sm:$0xf] }
  0x14   : > { %v338_v14 = vunpack.c.l.bf16 %v337_v13 }
  0x16   : > { %354 = vrot.lane.b32.xlu0 %v831_v5, %s871_s15 }
  0x84   : > { %v350_v6 = vpop.permute.xlu0 %349  ;;  %v360_v8 = vpop.permute.xlu1 %359 }
  0x85   : > { %v364_v9 = vsel %vm361_vm1, %v339_v7, %v350_v6 }
  0x88   : > { %v355_v10 = vpop.permute.xlu0 %354 }
  0x89   : > { %v367_v11 = vsel %vm365_vm2, %v364_v9, %v355_v10 }
  0x8a   : > { %v370_v12 = vsel %vm368_vm3, %v367_v11, %v360_v8 }
  0x8b   : > { %774 = vmatmul.mubr.msk.bf16.vlgmr.msra.gmra.mrb[0].mxu0 %vm387_vm4, %v370_v12 }
  0x8c   : > { %789 = vmatprep.mubr.msk.bf16.mxu0 %vm868_vm0, %v867_v1  ;;  %786 = vmatpush3.bf16.msra.mxu0 %v837_v24 }
  0x8d   : > { %787 = vmatprep.subr.bf16.mxu0 %v867_v1 }
  0x90   : > { %788 = vmatpush3.bf16.msra.mxu0 %v838_v33 }
 0x15e   : > { %v424_v15 = vpop.f32.mrb[0].mxu0 }
 0x15f   : > { %v430_v16 = vadd.f32 %v424_v15, %v338_v14  ;;  %v775_v17 = vpop.f32.mrb[1].mxu0 }
 0x160   : > { %v427_v18 = vpop.f32.mrb[2].mxu0 }
 0x161   : > { %v776_v19 = vpop.f32.mrb[3].mxu0  ;;  %v432_v20 = vmul.f32 %v430_v16, %v430_v16 }
 0x163   : > { %v433_v21 = vsel %vm387_vm4, %v432_v20, 0.0 }
 0x164   : > { %434 = vadd.xlane.f32.xlu1 %v433_v21 }
 0x1f1   : > { %v435_v25 = vpop.xlane.xlu1 %434 }
 0x1f2   : > { %v437_v26 = vmul.f32 0.03125, %v435_v25 }
 0x1f4   : > { %v438_v27 = vadd.f32 1e-06, %v437_v26 }
 0x1f6   : > { %841 = vrsqrt.f32 %v438_v27 }
 0x200   : > { %v842_v28 = vpop.eup %841 }
 0x201   : > { %v440_v30 = vmul.f32 %v842_v28, %v430_v16 }
 0x203   : > { %v447_v31 = vmul.f32 %v744_v29, %v440_v30 }
 0x205   : > { %v448_v32 = vpack.c.bf16 %v447_v31, %v447_v31 }
 0x207   : > { %782 = vmatmul.mubr.msk.bf16.vlgmr.msra.gmra.mrb[0].mxu1 %vm387_vm4, %v448_v32 }
 0x208   : > { %797 = vmatprep.mubr.msk.bf16.mxu1 %vm868_vm0, %v867_v1  ;;  %794 = vmatpush3.bf16.msra.mxu1 %v839_v34 }
 0x209   : > { %795 = vmatprep.subr.bf16.mxu1 %v867_v1 }
 0x20c   : > { %796 = vmatpush3.bf16.msra.mxu1 %v840_v41 }
 0x2da   : > { %v502_v35 = vpop.f32.mrb[0].mxu1 }
 0x2db   : > { %v508_v36 = vmax.f32 %v502_v35, 0.0  ;;  %v783_v37 = vpop.f32.mrb[1].mxu1 }
 0x2dc   : > { %v505_v38 = vpop.f32.mrb[2].mxu1 }
 0x2dd   : > { %v509_v39 = vpack.c.bf16 %v508_v36, %v508_v36  ;;  %v784_v40 = vpop.f32.mrb[3].mxu1 }
 0x2df   : > { %790 = vmatmul.mubr.msk.bf16.vlgmr.msra.gmra.mrb[4].mxu0 %vm387_vm4, %v509_v39 }
 0x3b2   : > { %v563_v42 = vpop.f32.mrb[4].mxu0 }
 0x3b3   : > { %v569_v43 = vmul.f32 %v563_v42, %v508_v36  ;;  %v791_v44 = vpop.f32.mrb[5].mxu0 }
 0x3b4   : > { %v566_v45 = vpop.f32.mrb[6].mxu0 }
 0x3b5   : > { %v570_v46 = vpack.c.bf16 %v569_v43, %v569_v43  ;;  %v792_v47 = vpop.f32.mrb[7].mxu0 }
 0x3b7   : > { %798 = vmatmul.mubr.msk.bf16.vlgmr.msra.gmra.mrb[4].mxu1 %vm387_vm4, %v570_v46 }
 0x48a   : > { %v624_v48 = vpop.f32.mrb[4].mxu1 }
 0x48b   : > { %v630_v49 = vadd.f32 %v624_v48, %v430_v16  ;;  %v799_v50 = vpop.f32.mrb[5].mxu1 }
 0x48c   : > { %v627_v51 = vpop.f32.mrb[6].mxu1 }
 0x48d   : > { %v631_v52 = vpack.c.bf16 %v630_v49, %v630_v49  ;;  %v800_v53 = vpop.f32.mrb[7].mxu1 }
 0x48f   : > { %633 = vst.msk [vmem:[%s335_s18] sm:$0xf] %vm632_vm5, %v631_v52 }
 0x490 PF: > { %s17_s26 = sadd.s32 1, %s865_s26   ;;  %s1012_s24 = smov %s861_s25 }
 0x491   : > { %p14_p5 = scmp.ge.s32.totalorder %s17_s26, 4   ;;  %s1013_s25 = smov %s1015_s27 }
 0x493   :  { %16 = sbr.rel (!%p14_p5) target bundleno = 2 (0x2), region = 84 }

// kernel: transformer_forward.11
= control target key start
LH: loop header
LB: loop body
LE: loop exit
PB: predicated region body
PF: predicated region fallthrough
CT: control target
= control target key end

     0   :  { %s766_s18 = smov 0   ;;  %s768_s19 = smov 0   ;;  %s839_s0 = inlined_call_operand.vmem [shape: bf16[2,8,32], index: 0, kind: input, shape index: {}]   ;;  %s840_s1 = inlined_call_operand.vmem [shape: f32[1,32], index: 1, kind: input, shape index: {}]   ;;  %s841_s2 = inlined_call_operand.vmem [shape: bf16[32,96], index: 2, kind: input, shape index: {}]   ;;  %s842_s3 = inlined_call_operand.vmem [shape: bf16[2,4,8,8], index: 3, kind: output, shape index: {0}]   ;;  %s843_s4 = inlined_call_operand.vmem [shape: bf16[2,4,8,8], index: 4, kind: output, shape index: {1}]   ;;  %s844_s5 = inlined_call_operand.vmem [shape: bf16[2,4,8,8], index: 5, kind: output, shape index: {2}]  }
   0x1   :  { %s770_s20 = smov 0  }
   0x2 LB: > { %s28_s21 = sadd.s32 1, %s717_s19  ;;  %p617_p0 = scmp.ge.s32.totalorder %s721_s20, 1  ;;  %s721_s20 = sphi %s770_s20, %s16_s20   ;;  %s717_s19 = sphi %s768_s19, %s846_s19   ;;  %s713_s18 = sphi %s766_s18, %s845_s18  }
   0x3   : > { %p30_p1 = scmp.ge.s32.totalorder %s28_s21, 2  ;;  %p214_p2 = scmp.lt.s32.totalorder %s721_s20, 3 }
   0x5   : > { %s848_s21 = smov (%p30_p1, %s28_s21), 0  ;;  %p215_p3 = pnand %p617_p0, %p214_p2 }
   0x6   : > { %p263_p4 = scmp.lt.s32.totalorder (!%p215_p3), %s713_s18, 1  ;;  %vm299_vm0 = vcmask (!%p215_p3), 261120   ;;  %v695_v4 = vld [vmem:[%s841_s2] sm:$0xff] (!%p215_p3)   ;;  %v723_v5 = vmov (!%p215_p3), 0.0   ;;  %vm724_vm1 = vmmov (!%p215_p3), 0   ;;  %v696_v6 = vld [vmem:[%s841_s2 + $0x8] sm:$0xff] (!%p215_p3)  }
   0x7   : > { %218 = sbr.rel (%p215_p3) target bundleno = 544 (0x220), region = 32  ;;  %650 = vmatprep.subr.bf16.mxu0 (!%p215_p3), %v723_v5  ;;  %654 = vmatprep.mubr.msk.bf16.mxu0 (!%p215_p3), %vm724_vm1, %v723_v5  ;;  %v625_v11 = vld [vmem:[%s840_s1] ss:$0 sm:$0xff] (!%p215_p3)  ;;  %vm377_vm2 = vcmask (!%p215_p3), 60416   ;;  %s725_s11 = smov (!%p215_p3), 64  }
   0x8   : > { %651 = vmatpush3.bf16.msra.mxu0 (!%p215_p3), %v695_v4  ;;  %s726_s12 = smov (!%p215_p3), 96   ;;  %s727_s13 = smov (!%p215_p3), 88  }
   0x9   : > { %652 = vmatprep.subr.bf16.mxu0 (!%p215_p3), %v723_v5  ;;  %s728_s14 = smov (!%p215_p3), 104   ;;  %s729_s15 = smov (!%p215_p3), 56  }
   0xa   : > { %s730_s16 = smov (!%p215_p3), 40   ;;  %s731_s17 = smov (!%p215_p3), 80  }
   0xb   : > { %s734_s23 = smov (!%p215_p3), 112   ;;  %s735_s24 = smov (!%p215_p3), 72  }
   0xc   : > { %653 = vmatpush3.bf16.msra.mxu0 (!%p215_p3), %v696_v6 }
   0xe   : > { %s850_s18 = smov (!%p263_p4, %s713_s18), 1 }
   0xf   : > { %s618_s22 = sshll.u32 %s850_s18, 2  ;;  %s798_s7 = sshll.u32 %s850_s18, 4 }
  0x10   : > { %s269_s25 = scalar_lea.vmem %s839_s0, %s618_s22  ;;  %s804_s10 = scalar_lea.vmem %s842_s3, %s798_s7 }
  0x11   : > { %v295_v0 = vld [vmem:[%s269_s25] sm:$0xf]  ;;  %s732_s18 = smov 48   ;;  %s733_s22 = smov 120  }
  0x12   : > { %v296_v1 = vunpack.c.l.bf16 %v295_v0  ;;  %s293_s27 = scalar_lea.vmem %s844_s5, %s798_s7  ;;  %s285_s30 = scalar_lea.vmem %s843_s4, %s798_s7 }
  0x14   : > { %v298_v2 = vmul.f32 %v296_v1, %v296_v1 }
  0x16   : > { %v300_v3 = vsel %vm299_vm0, %v298_v2, 0.0 }
  0x17   : > { %301 = vadd.xlane.f32.xlu0 %v300_v3 }
  0xa4   : > { %v302_v7 = vpop.xlane.xlu0 %301 }
  0xa5   : > { %v304_v8 = vmul.f32 0.03125, %v302_v7 }
  0xa7   : > { %v305_v9 = vadd.f32 1e-06, %v304_v8 }
  0xa9   : > { %697 = vrsqrt.f32 %v305_v9 }
  0xb3   : > { %v698_v10 = vpop.eup %697 }
  0xb4   : > { %v307_v12 = vmul.f32 %v698_v10, %v296_v1 }
  0xb6   : > { %v314_v13 = vmul.f32 %v625_v11, %v307_v12 }
  0xb8   : > { %v315_v14 = vpack.c.bf16 %v314_v13, %v314_v13 }
  0xba   : > { %655 = vmatmul.mubr.msk.bf16.vlgmr.msra.gmra.mrb[0].mxu0 %vm299_vm0, %v315_v14 }
 0x18d   : > { %v369_v15 = vpop.f32.mrb[0].mxu0 }
 0x18e   : > { %v375_v16 = vmul.f32 0.35355338, %v369_v15  ;;  %v645_v17 = vpack.c.bf16 %v369_v15, %v369_v15  ;;  %v656_v18 = vpop.f32.mrb[1].mxu0 }
 0x18f   : > { %v372_v19 = vpop.f32.mrb[2].mxu0 }
 0x190   : > { %v376_v20 = vpack.c.bf16 %v375_v16, %v375_v16  ;;  %387 = vrot.lane.b32.xlu1 %v645_v17, %s725_s11  ;;  %383 = vrot.lane.b32.xlu0 %v645_v17, %s726_s12  ;;  %v657_v21 = vpop.f32.mrb[3].mxu0 }
 0x192   : > { %378 = vst.msk [vmem:[%s804_s10] sm:$0xf] %vm377_vm2, %v376_v20 }
 0x194   : > { %399 = vrot.lane.b32.xlu1 %v645_v17, %s727_s13  ;;  %424 = vrot.lane.b32.xlu0 %v376_v20, %s728_s14 }
 0x198   : > { %404 = vrot.lane.b32.xlu1 %v645_v17, %s729_s15  ;;  %434 = vrot.lane.b32.xlu0 %v645_v17, %s730_s16 }
 0x19c   : > { %414 = vrot.lane.b32.xlu1 %v645_v17, %s731_s17 }
 0x1a0   : > { %419 = vrot.lane.b32.xlu1 %v645_v17, %s732_s18 }
 0x1a4   : > { %394 = vrot.lane.b32.xlu1 %v376_v20, %s733_s22 }
 0x1a8   : > { %409 = vrot.lane.b32.xlu1 %v376_v20, %s734_s23 }
 0x1ac   : > { %429 = vrot.lane.b32.xlu1 %v645_v17, %s735_s24 }
 0x202   : > { %v388_v22 = vpop.permute.xlu1 %387  ;;  %v384_v23 = vpop.permute.xlu0 %383 }
 0x203   : > { %390 = vst.msk [vmem:[%s293_s27] sm:$0xf] %vm377_vm2, %v388_v22  ;;  %386 = vst.msk [vmem:[%s285_s30] sm:$0xf] %vm377_vm2, %v384_v23 }
 0x206   : > { %v400_v24 = vpop.permute.xlu1 %399  ;;  %v425_v25 = vpop.permute.xlu0 %424 }
 0x207   : > { %632 = vst.msk [vmem:[%s285_s30 + $0x4] sm:$0xf] %vm377_vm2, %v400_v24  ;;  %637 = vst.msk [vmem:[%s804_s10 + $0xc] sm:$0xf] %vm377_vm2, %v425_v25 }
 0x20a   : > { %v405_v26 = vpop.permute.xlu1 %404  ;;  %v435_v27 = vpop.permute.xlu0 %434 }
 0x20b   : > { %633 = vst.msk [vmem:[%s293_s27 + $0x4] sm:$0xf] %vm377_vm2, %v405_v26  ;;  %639 = vst.msk [vmem:[%s293_s27 + $0xc] sm:$0xf] %vm377_vm2, %v435_v27 }
 0x20e   : > { %v415_v28 = vpop.permute.xlu1 %414 }
 0x20f   : > { %635 = vst.msk [vmem:[%s285_s30 + $0x8] sm:$0xf] %vm377_vm2, %v415_v28 }
 0x212   : > { %v420_v29 = vpop.permute.xlu1 %419 }
 0x213   : > { %636 = vst.msk [vmem:[%s293_s27 + $0x8] sm:$0xf] %vm377_vm2, %v420_v29 }
 0x216   : > { %v395_v30 = vpop.permute.xlu1 %394 }
 0x217   : > { %631 = vst.msk [vmem:[%s804_s10 + $0x4] sm:$0xf] %vm377_vm2, %v395_v30 }
 0x21a   : > { %v410_v31 = vpop.permute.xlu1 %409 }
 0x21b   : > { %634 = vst.msk [vmem:[%s804_s10 + $0x8] sm:$0xf] %vm377_vm2, %v410_v31 }
 0x21e   : > { %v430_v32 = vpop.permute.xlu1 %429 }
 0x21f   : > { %638 = vst.msk [vmem:[%s285_s30 + $0xc] sm:$0xf] %vm377_vm2, %v430_v32 }
 0x220 PF: > { %s16_s20 = sadd.s32 1, %s721_s20   ;;  %s845_s18 = smov %s717_s19 }
 0x221   : > { %p13_p5 = scmp.ge.s32.totalorder %s16_s20, 4   ;;  %s846_s19 = smov %s848_s21 }
 0x223   :  { %15 = sbr.rel (!%p13_p5) target bundleno = 2 (0x2), region = 95 }

// kernel: transformer_forward.14
= control target key start
LH: loop header
LB: loop body
LE: loop exit
PB: predicated region body
PF: predicated region fallthrough
CT: control target
= control target key end

     0   :  { %10 = vsyncpa [#allocation5], 0  ;;  %s889_s0 = inlined_call_operand.vmem [shape: bf16[2,8,32], index: 0, kind: input, shape index: {}]   ;;  %s890_s1 = inlined_call_operand.vmem [shape: bf16[32,64], index: 1, kind: input, shape index: {}]   ;;  %s891_s2 = inlined_call_operand.vmem [shape: f32[1,64], index: 2, kind: input, shape index: {}]   ;;  %s892_s3 = inlined_call_operand.hbm [shape: f32[2,8,64], index: 3, kind: output, shape index: {0}]   ;;  %s893_s4 = inlined_call_operand.vmem [shape: f32[2,8,1], index: 4, kind: output, shape index: {1}]  }
   0x1   :  { %12 = vsyncpa [#allocation5 + $0x1], 0  ;;  %s755_s15 = smov 0   ;;  %s757_s16 = smov 0  }
   0x2   :  { %s759_s17 = smov 0   ;;  %s761_s18 = smov 0  }
   0x3   :  { %s763_s19 = smov 0   ;;  %s765_s20 = smov 0  }
   0x4 LB: > { %s548_s21 = sadd.s32 4294967295, %s723_s20   ;;  %s549_s22 = sadd.s32 4294967294, %s723_s20   ;;  %s723_s20 = sphi %s765_s20, %s18_s20   ;;  %s719_s19 = sphi %s763_s19, %s900_s19   ;;  %s715_s18 = sphi %s761_s18, %s899_s18   ;;  %s711_s17 = sphi %s759_s17, %s898_s17   ;;  %s707_s16 = sphi %s757_s16, %s897_s16   ;;  %s703_s15 = sphi %s755_s15, %s896_s15  }
   0x5   : > { %s37_s23 = sadd.s32 1, %s719_s19  ;;  %s128_s24 = sadd.s32 1, %s711_s17 }
   0x6   : > { %p39_p0 = scmp.ge.s32.totalorder %s37_s23, 2  ;;  %p138_p1 = scmp.ne.s32.totalorder %s711_s17, %s707_s16 }
   0x7   : > { %p139_p2 = scmp.eq.s32.totalorder %s548_s21, 1  ;;  %p144_p3 = scmp.ne.s32.totalorder %s707_s16, %s703_s15 }
   0x8   : > { %s902_s23 = smov (%p39_p0, %s37_s23), 0  ;;  %p145_p5 = scmp.eq.s32.totalorder %s549_s22, 1 }
   0x9   : > { %p795_p4 = por %p139_p2, %p138_p1  ;;  %s121_s26 = ssub.s32 %s719_s19, %s902_s23 }
   0xa   : > { %p554_p6 = scmp.ge.s32.totalorder %s723_s20, 1  ;;  %p126_p7 = scmp.eq.s32.totalorder %s121_s26, 0 }
   0xb   : > { %p802_p8 = por %p145_p5, %p144_p3  ;;  %p214_p9 = scmp.lt.s32.totalorder %s723_s20, 3 }
   0xc   : > { %s808_s28 = scalar_select %p126_p7, %s711_s17, %s128_s24  }
   0xd   : > { %p215_p10 = pnand %p554_p6, %p214_p9 }
   0xe   : > { %vm282_vm0 = vcmask (!%p215_p10), 7168   ;;  %v725_v0 = vmov (!%p215_p10), 0.0   ;;  %v637_v1 = vld [vmem:[%s890_s1] sm:$0xff] (!%p215_p10)   ;;  %vm726_vm1 = vmmov (!%p215_p10), 0   ;;  %p256_p11 = scmp.lt.s32.totalorder (!%p215_p10), %s715_s18, 1  ;;  %v638_v2 = vld [vmem:[%s890_s1 + $0x8] sm:$0xff] (!%p215_p10)  }
   0xf   : > { %218 = sbr.rel (%p215_p10) target bundleno = 698 (0x2ba), region = 32  ;;  %284 = vst.msk [vmem:[#allocation3] sm:$0xff] (!%p215_p10), %vm282_vm0, %v725_v0  ;;  %569 = vmatprep.subr.bf16.mxu0 (!%p215_p10), %v725_v0  ;;  %573 = vmatprep.mubr.msk.bf16.mxu0 (!%p215_p10), %vm726_vm1, %v725_v0  ;;  %vm309_vm2 = vcmask (!%p215_p10), 261120   ;;  %v727_v4 = vmov (!%p215_p10), -inf   ;;  %s244_s12 = sand.u32 (!%p215_p10), 1, %s707_s16   ;;  %vm353_vm3 = vcmask (!%p215_p10), 523264  }
  0x10   : > { %570 = vmatpush3.bf16.msra.mxu0 (!%p215_p10), %v637_v1  ;;  %283 = vst.msk [vmem:[#allocation2] sm:$0xff] (!%p215_p10), %vm282_vm0, %v727_v4  ;;  %s555_s13 = sshll.u32 (!%p215_p10), %s244_s12, 3  ;;  %v558_v5 = vld [vmem:[%s891_s2] ss:$0 sm:$0xff] (!%p215_p10)  ;;  %v728_v12 = vmov (!%p215_p10), 0   ;;  %s563_s24 = sshll.u32 (!%p215_p10), %s715_s18, 7 }
  0x11   : > { %571 = vmatprep.subr.bf16.mxu0 (!%p215_p10), %v725_v0  ;;  %s246_s22 = scalar_lea.vmem (!%p215_p10), [#allocation4], %s555_s13  ;;  %636 = vset.pattern.permute.xlu0 (!%p215_p10), %v728_v12  ;;  %s840_s5 = scalar_lea.hbm (!%p215_p10), %s892_s3, %s563_s24 }
  0x12   : > { %s412_s26 = sshll.u32 (!%p215_p10), %s246_s22, 4  ;;  %s390_s6 = scalar_lea.sflag (!%p215_p10), [#allocation5], %s244_s12  ;;  %s413_s26 = int_to_ptr.vmem [resolvable:$true] %s412_s26 }
  0x13   : > { %s729_s9 = smov (!%p215_p10), [#allocation4]  }
  0x14   : > { %572 = vmatpush3.bf16.msra.mxu0 (!%p215_p10), %v638_v2  ;;  %s649_s10 = sshll.u32 (!%p215_p10), %s729_s9, 4  ;;  %s650_s10 = int_to_ptr.vmem [resolvable:$false] %s649_s10 }
  0x15   : > { %p652_p1 = scmp.lt.s32.totalorder (!%p215_p10), %s413_s26, %s650_s10 }
  0x16   : > { %s819_s7 = scalar_select %p256_p11, %s715_s18, 1 }
  0x17   : > { %v355_v13 = vld [vmem:[#allocation2] sm:$0xff] }
  0x18   : > { %s556_s8 = sshll.u32 %s819_s7, 2 }
  0x19   : > { %s262_s11 = scalar_lea.vmem %s889_s0, %s556_s8  ;;  %s645_s8 = scalar_lea.vmem %s413_s26, 128 }
  0x1a   : > { %v285_v3 = vld [vmem:[%s262_s11] sm:$0xf]  ;;  %p646_p12 = scmp.ne.s32.totalorder %s413_s26, %s645_s8  ;;  %s651_s11 = scalar_lea.vmem %s650_s10, 256 }
  0x1b   : > { %574 = vmatmul.mubr.msk.bf16.vlgmr.msra.gmra.mrb[0].mxu0 %vm309_vm2, %v285_v3  ;;  %p653_p2 = scmp.lt.s32.totalorder %s651_s11, %s645_s8 }
  0x1c   : > { %p647_p13 = pnand %p646_p12, %p795_p4 }
  0x1d   : > { %p654_p3 = por %p653_p2, %p652_p1 }
  0x1e   : > { %p648_p0 = pneg %p647_p13 }
  0x20   : > { %p655_p5 = pnand %p654_p3, %p648_p0 }
  0xee   : > { %v347_v6 = vpop.f32.mrb[0].mxu0 }
  0xef   : > { %v348_v7 = vadd.f32 %v558_v5, %v347_v6  ;;  %v575_v8 = vpop.f32.mrb[1].mxu0 }
  0xf0   : > { %v350_v9 = vpop.f32.mrb[2].mxu0 }
  0xf1   : > { %v576_v10 = vpop.f32.mrb[3].mxu0  ;;  %v356_v11 = vsel %vm353_vm3, %v348_v7, -inf  ;;  %354 = vst.msk [vmem:[%s246_s22] sm:$0xff] %vm353_vm3, %v348_v7 }
  0xf2   : > { %357 = vmax.xlane.f32.xlu0 %v356_v11 }
 0x17f   : > { %v358_v14 = vpop.xlane.xlu0 %357 }
 0x180   : > { %v359_v15 = vmax.f32 %v355_v13, %v358_v14 }
 0x182   : > { %v361_v16 = vsub.f32 %v355_v13, %v359_v15  ;;  %379 = vst.msk [vmem:[#allocation2] sm:$0xff] %vm282_vm0, %v359_v15  ;;  %367 = vperm.xlu0 %636, %v359_v15  }
 0x201   : > { %v368_v17 = vpop.permute.xlu0 %367 }
 0x202   : > { %v370_v18 = vsub.f32 %v348_v7, %v368_v17 }
 0x204   : > { %v371_v19 = vmul.f32 1.442695, %v370_v18 }
 0x206   : > { %639 = vpow2.f32 %v371_v19 }
 0x210   : > { %v640_v20 = vpop.eup %639 }
 0x211   : > { %v373_v21 = vsel %vm353_vm3, %v640_v20, 0.0 }
 0x212   : > { %374 = vadd.xlane.f32.xlu1 %v373_v21 }
 0x213   : > { %658 = shalt.err (!%p655_p5)
}
 0x214   : > { %s659_s18 = scalar_lea.hbm %s840_s5, 128  ;;  %s663_s14 = scalar_lea.hbm %s892_s3, 256 }
 0x215   : > { %p660_p6 = scmp.ne.s32.totalorder %s840_s5, %s659_s18  ;;  %p664_p10 = scmp.lt.u32.totalorder %s840_s5, %s892_s3 }
 0x216   : > { %p665_p11 = scmp.lt.u32.totalorder %s663_s14, %s659_s18  ;;  %p667_p13 = scmp.lt.u32.totalorder %s659_s18, %s840_s5 }
 0x217   : > { %p661_p7 = pnand %p660_p6, %p795_p4 }
 0x218   : > { %p666_p12 = por %p665_p11, %p664_p10 }
 0x219   : > { %p662_p9 = pneg %p661_p7 }
 0x21a   : > { %p668_p0 = por %p667_p13, %p666_p12 }
 0x21c   : > { %p669_p1 = pnand %p668_p0, %p662_p9 }
 0x21e   : > { %672 = shalt.err (!%p669_p1)
}
 0x21f   : > { %577 = dma.vmem_to_hbm [thread:$0]  (%p795_p4), %s413_s26, 128, %s840_s5, %s390_s6   ;;  %v362_v22 = vmul.f32 1.442695, %v361_v16  ;;  %v360_v24 = vld [vmem:[#allocation3] sm:$0xff]  ;;  %v383_v31 = vld [vmem:[#allocation2] sm:$0xff] }
 0x220   : > { %s557_s24 = sshll.u32 %s819_s7, 3 }
 0x221   : > { %641 = vpow2.f32 %v362_v22  ;;  %s276_s25 = scalar_lea.vmem %s893_s4, %s557_s24 }
 0x22b   : > { %v642_v23 = vpop.eup %641 }
 0x22c   : > { %v364_v25 = vmul.f32 %v642_v23, %v360_v24 }
 0x29f   : > { %v375_v26 = vpop.xlane.xlu1 %374 }
 0x2a0   : > { %v376_v27 = vadd.f32 %v375_v26, %v364_v25 }
 0x2a2   : > { %378 = vst.msk [vmem:[#allocation3] sm:$0xff] %vm282_vm0, %v376_v27 }
 0x2a9   : > { %v384_v28 = vld [vmem:[#allocation3] sm:$0xff] }
 0x2aa   : > { %643 = vlog2.f32 %v384_v28 }
 0x2b4   : > { %v644_v29 = vpop.eup %643 }
 0x2b5   : > { %v386_v30 = vmul.f32 0.6931472, %v644_v29 }
 0x2b7   : > { %v387_v32 = vadd.f32 %v386_v30, %v383_v31 }
 0x2b9   : > { %388 = vst.msk [vmem:[%s276_s25] sm:$0xff] %vm282_vm0, %v387_v32 }
 0x2ba PF: > { %p583_p4 = scmp.ge.s32.totalorder %s723_s20, 2  ;;  %s427_s26 = sand.u32 1, %s703_s15  }
 0x2bb   : > { %s428_s5 = scalar_lea.sflag [#allocation5], %s427_s26 }
 0x2bc   : > { %p580_p2 = pnand %p583_p4, %p802_p8 }
 0x2be   : > { %698 = dma.done.wait (!%p580_p2), %s428_s5, 128  }
 0x2bf   : > { %700 = vsyncadd (!%p580_p2), %s428_s5, 4294967168  ;;  %s18_s20 = sadd.s32 1, %s723_s20   ;;  %s896_s15 = smov %s707_s16 }
 0x2c0   : > { %p15_p3 = scmp.ge.s32.totalorder %s18_s20, 4   ;;  %s897_s16 = smov %s711_s17 }
 0x2c1   : > { %s898_s17 = smov %s808_s28  ;;  %s899_s18 = smov %s719_s19 }
 0x2c2   : > { %s900_s19 = smov %s902_s23  ;;  %17 = sbr.rel (!%p15_p3) target bundleno = 4 (0x4), region = 93 }
 0x2c9   :  { %443 = vsyncpa [#allocation5], 1 }
 0x2ca   :  { %445 = vsyncpa [#allocation5 + $0x1], 1 }

// kernel: transformer_forward.15
= control target key start
LH: loop header
LB: loop body
LE: loop exit
PB: predicated region body
PF: predicated region fallthrough
CT: control target
= control target key end

     0   :  { %7 = vsyncpa [#allocation3], 0  ;;  %s729_s0 = inlined_call_operand.hbm [shape: f32[2,8,64], index: 0, kind: input, shape index: {}, may-alias: {0,2}]   ;;  %s730_s1 = inlined_call_operand.vmem [shape: f32[2,8,1], index: 1, kind: input, shape index: {}]   ;;  %s731_s2 = inlined_call_operand.hbm [shape: f32[2,8,64], index: 2, kind: output, shape index: {}, may-alias: {0,2}]  }
   0x1   :  { %9 = vsyncpa [#allocation3 + $0x1], 0 }
   0x2   :  { %10 = vsyncpa [#allocation4], 0 }
   0x3   :  { %12 = vsyncpa [#allocation4 + $0x1], 0  ;;  %s552_s9 = smov 0   ;;  %s554_s10 = smov 0  }
   0x4   :  { %s556_s11 = smov 0   ;;  %s558_s12 = smov 0  }
   0x5   :  { %s560_s13 = smov 0   ;;  %s562_s14 = smov 0  }
   0x6 LB: > { %s342_s15 = sadd.s32 4294967295, %s532_s14   ;;  %s343_s16 = sadd.s32 4294967294, %s532_s14   ;;  %s532_s14 = sphi %s562_s14, %s18_s14   ;;  %s528_s13 = sphi %s560_s13, %s747_s13   ;;  %s524_s12 = sphi %s558_s12, %s746_s12   ;;  %s520_s11 = sphi %s556_s11, %s745_s11   ;;  %s516_s10 = sphi %s554_s10, %s744_s10   ;;  %s512_s9 = sphi %s552_s9, %s743_s9  }
   0x7   : > { %s37_s17 = sadd.s32 1, %s528_s13  ;;  %s48_s18 = sadd.s32 1, %s520_s11 }
   0x8   : > { %p39_p0 = scmp.ge.s32.totalorder %s37_s17, 2  ;;  %p55_p1 = scmp.ne.s32.totalorder %s520_s11, %s516_s10 }
   0x9   : > { %p56_p2 = scmp.eq.s32.totalorder %s532_s14, 0  ;;  %p61_p3 = scmp.ne.s32.totalorder %s516_s10, %s512_s9 }
   0xa   : > { %s749_s17 = smov (%p39_p0, %s37_s17), 0  ;;  %p62_p5 = scmp.eq.s32.totalorder %s342_s15, 0 }
   0xb   : > { %p593_p4 = por %p56_p2, %p55_p1  ;;  %s41_s20 = ssub.s32 %s528_s13, %s749_s17 }
   0xc   : > { %p117_p6 = scmp.eq.s32.totalorder %s342_s15, 1  ;;  %p46_p7 = scmp.eq.s32.totalorder %s41_s20, 0 }
   0xd   : > { %p599_p8 = por %p62_p5, %p61_p3  ;;  %p123_p10 = scmp.eq.s32.totalorder %s343_s16, 1 }
   0xe   : > { %p603_p9 = por %p117_p6, %p55_p1  ;;  %p368_p13 = scmp.lt.s32.totalorder %s532_s14, 2 }
   0xf   : > { %s608_s23 = scalar_select %p46_p7, %s520_s11, %s48_s18  }
  0x10   : > { %s735_s22 = scalar_select %p603_p9, 1, 0 }
  0x11   : > { %p610_p11 = por %p123_p10, %p61_p3  ;;  %s143_s25 = sand.u32 1, %s520_s11  }
  0x12   : > { %s346_s26 = sshll.u32 %s143_s25, 3  ;;  %s347_s27 = sshll.u32 %s528_s13, 7 }
  0x13   : > { %s736_s24 = scalar_select %p610_p11, 1, 0 }
  0x14   : > { %s621_s30 = scalar_lea.hbm %s729_s0, %s347_s27  ;;  %s147_s3 = scalar_lea.vmem [#allocation2], %s346_s26 }
  0x15   : > { %s156_s4 = sshll.u32 %s147_s3, 4  ;;  %p627_p0 = pnand %p368_p13, %p593_p4  ;;  %s623_s4 = int_to_ptr.vmem [resolvable:$true] %s156_s4 }
  0x16   : > { %s144_s6 = scalar_lea.sflag [#allocation3], %s143_s25  ;;  %s420_s7 = scalar_lea.hbm %s621_s30, 128 }
  0x17   : > { %p421_p3 = scmp.ne.s32.totalorder %s621_s30, %s420_s7  ;;  %p422_p5 = pneg %p627_p0 }
  0x18   : > { %s425_s16 = scalar_lea.hbm %s729_s0, 256  ;;  %p426_p4 = scmp.lt.u32.totalorder %s621_s30, %s729_s0 }
  0x19   : > { %p423_p6 = pnand %p422_p5, %p421_p3  ;;  %p427_p10 = scmp.lt.u32.totalorder %s425_s16, %s420_s7 }
  0x1a   : > { %p429_p12 = scmp.lt.u32.totalorder %s420_s7, %s621_s30 }
  0x1b   : > { %p424_p7 = pneg %p423_p6  ;;  %p428_p13 = por %p427_p10, %p426_p4 }
  0x1d   : > { %p430_p1 = por %p429_p12, %p428_p13 }
  0x1f   : > { %p431_p2 = pnand %p430_p1, %p424_p7 }
  0x21   : > { %434 = shalt.err (!%p431_p2)
}
  0x22   : > { %s435_s20 = scalar_lea.vmem %s623_s4, 128  ;;  %s534_s25 = smov [#allocation2]  }
  0x23   : > { %p436_p3 = scmp.ne.s32.totalorder %s623_s4, %s435_s20  ;;  %s440_s26 = sshll.u32 %s534_s25, 4  ;;  %s441_s26 = int_to_ptr.vmem [resolvable:$false] %s440_s26 }
  0x24   : > { %s442_s27 = scalar_lea.vmem %s441_s26, 256  ;;  %p443_p9 = scmp.lt.s32.totalorder %s623_s4, %s441_s26 }
  0x25   : > { %p438_p6 = pnand %p436_p3, %p422_p5  ;;  %p444_p4 = scmp.lt.s32.totalorder %s442_s27, %s435_s20 }
  0x27   : > { %p439_p11 = pneg %p438_p6  ;;  %p445_p10 = por %p444_p4, %p443_p9 }
  0x29   : > { %p446_p12 = pnand %p445_p10, %p439_p11 }
  0x2b   : > { %449 = shalt.err (!%p446_p12)
}
  0x2c   : > { %363 = dma.hbm_to_vmem [thread:$0]  (!%p627_p0), %s621_s30, 128, %s623_s4, %s144_s6  }
  0x2d   : > { %p738_p1 = scmp.lt.s32.totalorder %s532_s14, 3  ;;  %p739_p2 = scmp.ge.s32.totalorder %s532_s14, 1 }
  0x2f   : > { %p172_p5 = pnand %p739_p2, %p738_p1 }
  0x30   : > { %s663_s28 = sand.u32 (!%p172_p5), 1, %s516_s10  }
  0x31   : > { %175 = sbr.rel (%p172_p5) target bundleno = 208 (0xd0), region = 28  ;;  %s349_s29 = sshll.u32 (!%p172_p5), %s663_s28, 3 }
  0x32   : > { %s178_s3 = scalar_lea.sflag (!%p172_p5), [#allocation3], %s663_s28  ;;  %s181_s7 = scalar_lea.vmem (!%p172_p5), [#allocation2], %s349_s29 }
  0x38   : > { %503 = dma.done.wait (%p599_p8), %s178_s3, 128  }
  0x39   : > { %505 = vsyncadd (%p599_p8), %s178_s3, 4294967168  ;;  %p209_p9 = scmp.lt.s32.totalorder %s524_s12, 1  ;;  %v535_v0 = vmov 0   ;;  %v216_v2 = vld [vmem:[%s181_s7] sm:$0xff]  ;;  %s353_s15 = sshll.u32 %s524_s12, 7  ;;  %vm224_vm0 = vcmask 523264  }
  0x3a   : > { %419 = vset.pattern.permute.xlu0 %v535_v0  ;;  %s208_s21 = scalar_lea.vmem [#allocation5], %s349_s29  ;;  %s680_s20 = scalar_lea.hbm %s731_s2, %s353_s15 }
  0x3b   : > { %s210_s30 = scalar_select %p209_p9, %s524_s12, 1 }
  0x3c   : > { %s242_s16 = sshll.u32 %s208_s21, 4  ;;  %s227_s25 = scalar_lea.sflag [#allocation4], %s663_s28  ;;  %s682_s16 = int_to_ptr.vmem [resolvable:$true] %s242_s16 }
  0x3d   : > { %s351_s4 = sshll.u32 %s210_s30, 3  ;;  %s450_s26 = scalar_lea.vmem %s682_s16, 128 }
  0x3e   : > { %s215_s8 = scalar_lea.vmem %s730_s1, %s351_s4  ;;  %p451_p8 = scmp.ne.s32.totalorder %s682_s16, %s450_s26 }
  0x3f   : > { %v217_v1 = vld [vmem:[%s215_s8] sm:$0xff]  ;;  %p740_p11 = scmp.ne.s32.totalorder %s735_s22, 0  ;;  %s536_s12 = smov [#allocation5]  }
  0x40   : > { %220 = vperm.xlu0 %419, %v217_v1   ;;  %s454_s27 = sshll.u32 %s536_s12, 4  ;;  %s455_s27 = int_to_ptr.vmem [resolvable:$false] %s454_s27 }
  0x41   : > { %p452_p0 = pnand %p451_p8, %p740_p11  ;;  %s456_s29 = scalar_lea.vmem %s455_s27, 256 }
  0x42   : > { %p457_p13 = scmp.lt.s32.totalorder %s682_s16, %s455_s27  ;;  %p458_p3 = scmp.lt.s32.totalorder %s456_s29, %s450_s26 }
  0x43   : > { %p453_p7 = pneg %p452_p0 }
  0x44   : > { %p459_p6 = por %p458_p3, %p457_p13 }
  0x46   : > { %p460_p4 = pnand %p459_p6, %p453_p7 }
  0xbf   : > { %v221_v3 = vpop.permute.xlu0 %220 }
  0xc0   : > { %v223_v4 = vsub.f32 %v216_v2, %v221_v3 }
  0xc2   : > { %225 = vst.msk [vmem:[%s208_s21] sm:$0xff] %vm224_vm0, %v223_v4 }
  0xc3   : > { %463 = shalt.err (!%p460_p4)
}
  0xc4   : > { %s464_s28 = scalar_lea.hbm %s680_s20, 128  ;;  %s468_s30 = scalar_lea.hbm %s731_s2, 256 }
  0xc5   : > { %p465_p10 = scmp.ne.s32.totalorder %s680_s20, %s464_s28  ;;  %p469_p2 = scmp.lt.u32.totalorder %s680_s20, %s731_s2 }
  0xc6   : > { %p470_p5 = scmp.lt.u32.totalorder %s468_s30, %s464_s28  ;;  %p472_p8 = scmp.lt.u32.totalorder %s464_s28, %s680_s20 }
  0xc7   : > { %p466_p12 = pnand %p465_p10, %p740_p11 }
  0xc8   : > { %p471_p9 = por %p470_p5, %p469_p2 }
  0xc9   : > { %p467_p1 = pneg %p466_p12 }
  0xca   : > { %p473_p0 = por %p472_p8, %p471_p9 }
  0xcc   : > { %p474_p7 = pnand %p473_p0, %p467_p1 }
  0xce   : > { %477 = shalt.err (!%p474_p7)
}
  0xcf   : > { %358 = dma.vmem_to_hbm [thread:$0]  (%p740_p11), %s682_s16, 128, %s680_s20, %s227_s25  }
  0xd0 PF: > { %s254_s6 = sand.u32 1, %s512_s9   ;;  %p741_p13 = scmp.ne.s32.totalorder %s736_s24, 0 }
  0xd1   : > { %p742_p3 = scmp.ge.s32.totalorder %s532_s14, 2  ;;  %s255_s8 = scalar_lea.sflag [#allocation4], %s254_s6 }
  0xd3   : > { %p365_p6 = pnand %p742_p3, %p741_p13 }
  0xd5   : > { %507 = dma.done.wait (!%p365_p6), %s255_s8, 128  }
  0xd6   : > { %509 = vsyncadd (!%p365_p6), %s255_s8, 4294967168  ;;  %s18_s14 = sadd.s32 1, %s532_s14   ;;  %s743_s9 = smov %s516_s10 }
  0xd7   : > { %p15_p4 = scmp.ge.s32.totalorder %s18_s14, 4   ;;  %s744_s10 = smov %s520_s11 }
  0xd8   : > { %s745_s11 = smov %s608_s23  ;;  %s746_s12 = smov %s528_s13 }
  0xd9   : > { %s747_s13 = smov %s749_s17  ;;  %17 = sbr.rel (!%p15_p4) target bundleno = 6 (0x6), region = 76 }
  0xe0   :  { %260 = vsyncpa [#allocation3], 1 }
  0xe1   :  { %262 = vsyncpa [#allocation3 + $0x1], 1 }
  0xe2   :  { %263 = vsyncpa [#allocation4], 1 }
  0xe3   :  { %265 = vsyncpa [#allocation4 + $0x1], 1 }

</bundles_post_ra>
